<compile_context>
chip_gen: v7x
topology: tpu7x:2x2x1
jax: 0.10.0
libtpu: 0.0.40
codegen_flags: <defaults>
</compile_context>

<pallas_src>
import functools

import jax
import jax.numpy as jnp
import numpy as np
from jax.experimental import pallas as pl
from jax.experimental.pallas import tpu as pltpu


def _round_up(x, m):
    return ((x + m - 1) // m) * m


def _default_vmem_limit():
    cap = 64 * 1024 * 1024
    try:
        info = pltpu.get_tpu_info()
        cap = int(getattr(info, "vmem_capacity_bytes", cap))
    except Exception:
        pass
    return int(min(max(cap * 3 // 4, 32 * 1024 * 1024), 100 * 1024 * 1024))


_VMEM_LIMIT = _default_vmem_limit()


# ---------------------------------------------------------------------------
# Fused GEMM + BN (scale/bias) [+ residual] [+ ReLU]
# Single full-K block per (i, j) tile: bf16 operands, f32 epilogue, bf16 output.
# Used for the stem (7x7) and the three stride-2 bottleneck blocks.
# ---------------------------------------------------------------------------
def _gemm_kernel(x_ref, w_ref, sc_ref, bi_ref, o_ref, *, relu):
    acc = jnp.dot(x_ref[...], w_ref[...], preferred_element_type=jnp.float32)
    y = acc * sc_ref[...] + bi_ref[...]
    if relu:
        y = jnp.maximum(y, 0.0)
    o_ref[...] = y.astype(o_ref.dtype)


def _gemm_res_kernel(x_ref, w_ref, sc_ref, bi_ref, r_ref, o_ref, *, relu):
    acc = jnp.dot(x_ref[...], w_ref[...], preferred_element_type=jnp.float32)
    y = acc * sc_ref[...] + bi_ref[...] + r_ref[...].astype(jnp.float32)
    if relu:
        y = jnp.maximum(y, 0.0)
    o_ref[...] = y.astype(o_ref.dtype)


def _gemm_tiles(M, K, N):
    if M <= 512:
        tm = _round_up(M, 8)
    elif K <= 512 and M % 1024 == 0:
        tm = 1024
    else:
        tm = 512
    if K > 2048:                           # cap VMEM when the whole K sits in one block
        tm = min(tm, 256)
    tn = min(N, 512)
    if N % tn:
        tn = N
    Mp = _round_up(M, tm)
    # Megacore (v7x): keep at least two blocks along a "parallel" axis when possible.
    if (Mp // tm) * (N // tn) == 1:
        if N >= 256 and N % 256 == 0:
            tn = N // 2
        elif M >= 16 and M % 16 == 0:
            tm = M // 2
            Mp = M
    return tm, tn, Mp


@functools.lru_cache(maxsize=None)
def _make_gemm(M, K, N, relu, has_res):
    tm, tn, Mp = _gemm_tiles(M, K, N)
    grid = (Mp // tm, N // tn)

    in_specs = [
        pl.BlockSpec((tm, K), lambda i, j: (i, 0)),
        pl.BlockSpec((K, tn), lambda i, j: (0, j)),
        pl.BlockSpec((1, tn), lambda i, j: (0, j)),
        pl.BlockSpec((1, tn), lambda i, j: (0, j)),
    ]
    if has_res:
        in_specs.append(pl.BlockSpec((tm, tn), lambda i, j: (i, j)))
        kernel = functools.partial(_gemm_res_kernel, relu=relu)
    else:
        kernel = functools.partial(_gemm_kernel, relu=relu)

    bytes_accessed = 2 * (M * K + K * N + M * N) + (2 * M * N if has_res else 0)
    call = pl.pallas_call(
        kernel,
        out_shape=jax.ShapeDtypeStruct((Mp, N), jnp.bfloat16),
        grid=grid,
        in_specs=in_specs,
        out_specs=pl.BlockSpec((tm, tn), lambda i, j: (i, j)),
        compiler_params=pltpu.CompilerParams(
            dimension_semantics=("parallel", "parallel"),
            vmem_limit_bytes=_VMEM_LIMIT),
        cost_estimate=pl.CostEstimate(flops=2 * M * K * N, transcendentals=0,
                                      bytes_accessed=bytes_accessed),
    )

    def fn(x, w, scale, bias, res=None):
        if Mp != M:                # safety only; never hit for the shapes this net uses
            x = jnp.pad(x, ((0, Mp - M), (0, 0)))
            if res is not None:
                res = jnp.pad(res, ((0, Mp - M), (0, 0)))
        args = (x, w, scale.reshape(1, N), bias.reshape(1, N))
        out = call(*args, res) if has_res else call(*args)
        return out if Mp == M else out[:M]

    return jax.jit(fn)


def fused_gemm(x, w, scale, bias, res=None, relu=True, use_pallas=True):
    M, K = x.shape
    N = w.shape[1]
    if not use_pallas:             # pure-JAX f32 reference
        y = jnp.dot(x.astype(jnp.float32), w.astype(jnp.float32),
                    preferred_element_type=jnp.float32)
        y = y * scale[None, :] + bias[None, :]
        if res is not None:
            y = y + res.astype(jnp.float32)
        if relu:
            y = jnp.maximum(y, 0.0)
        return y.astype(jnp.bfloat16)
    fn = _make_gemm(int(M), int(K), int(N), bool(relu), res is not None)
    if res is None:
        return fn(x, w, scale, bias)
    return fn(x, w, scale, bias, res)


# ---------------------------------------------------------------------------
# Fused stride-1 bottleneck block:
#   conv1 1x1 + BN + ReLU -> conv2 3x3(s1) + BN + ReLU -> conv3 1x1 + BN
#   (+ optional 1x1 downsample) + residual + ReLU
# One pallas_call per block; grid over batch; all intermediates live in VMEM.
# The 3x3 is done with 9 whole-tile dots over the flattened zero-padded image.
# ---------------------------------------------------------------------------
def _bottleneck_kernel(x_ref, w1_ref, s1_ref, b1_ref,
                       w2_ref, s2_ref, b2_ref,
                       w3_ref, s3_ref, b3_ref,
                       *rest, h, w, has_down):
    if has_down:
        wd_ref, sd_ref, bd_ref, o_ref, y1_ref, pad_ref, wide_ref, y2_ref = rest
    else:
        o_ref, y1_ref, pad_ref, wide_ref, y2_ref = rest

    wp = w + 2
    img = (h + 2) * wp                        # flattened padded image rows

    # --- conv1 (1x1) + BN + ReLU -------------------------------------------
    y1 = jnp.dot(x_ref[...], w1_ref[...], preferred_element_type=jnp.float32)
    y1 = jnp.maximum(y1 * s1_ref[...] + b1_ref[...], 0.0)
    y1_ref[...] = y1.astype(y1_ref.dtype)

    # --- scatter rows into the zero-padded, spatially flattened image -------
    pad_ref[...] = jnp.zeros(pad_ref.shape, pad_ref.dtype)
    for y in range(h):
        dst = (y + 1) * wp + 1
        pad_ref[dst:dst + w, :] = y1_ref[y * w:(y + 1) * w, :]

    # --- conv2 (3x3, stride 1): 9 whole-tile shifted dots --------------------
    planes = w2_ref.shape[2]
    acc = jnp.zeros((img, planes), jnp.float32)
    for dh in range(3):
        for dw in range(3):
            off = dh * wp + dw
            acc = acc + jnp.dot(pad_ref[off:off + img, :], w2_ref[dh * 3 + dw],
                                preferred_element_type=jnp.float32)
    acc = jnp.maximum(acc * s2_ref[...] + b2_ref[...], 0.0)
    wide_ref[...] = acc.astype(wide_ref.dtype)

    # --- compact the valid output rows (drop the spatial padding columns) ---
    for y in range(h):
        y2_ref[y * w:(y + 1) * w, :] = wide_ref[y * wp:y * wp + w, :]

    # --- conv3 (1x1) + BN + residual + ReLU ----------------------------------
    y3 = jnp.dot(y2_ref[...], w3_ref[...], preferred_element_type=jnp.float32)
    y3 = y3 * s3_ref[...] + b3_ref[...]
    if has_down:
        idn = jnp.dot(x_ref[...], wd_ref[...], preferred_element_type=jnp.float32)
        idn = idn * sd_ref[...] + bd_ref[...]
    else:
        idn = x_ref[...].astype(jnp.float32)
    o_ref[...] = jnp.maximum(y3 + idn, 0.0).astype(o_ref.dtype)


@functools.lru_cache(maxsize=None)
def _make_bottleneck(n, h, w, cin, planes, cout, has_down):
    hw = h * w
    wp = w + 2
    img = (h + 2) * wp
    kernel = functools.partial(_bottleneck_kernel, h=h, w=w, has_down=has_down)

    in_specs = [
        pl.BlockSpec((None, hw, cin), lambda b: (b, 0, 0)),
        pl.BlockSpec((cin, planes), lambda b: (0, 0)),
        pl.BlockSpec((1, planes), lambda b: (0, 0)),
        pl.BlockSpec((1, planes), lambda b: (0, 0)),
        pl.BlockSpec((9, planes, planes), lambda b: (0, 0, 0)),
        pl.BlockSpec((1, planes), lambda b: (0, 0)),
        pl.BlockSpec((1, planes), lambda b: (0, 0)),
        pl.BlockSpec((planes, cout), lambda b: (0, 0)),
        pl.BlockSpec((1, cout), lambda b: (0, 0)),
        pl.BlockSpec((1, cout), lambda b: (0, 0)),
    ]
    if has_down:
        in_specs += [
            pl.BlockSpec((cin, cout), lambda b: (0, 0)),
            pl.BlockSpec((1, cout), lambda b: (0, 0)),
            pl.BlockSpec((1, cout), lambda b: (0, 0)),
        ]

    flops = 2 * n * (hw * cin * planes + 9 * img * planes * planes
                     + hw * planes * cout + (hw * cin * cout if has_down else 0))
    bytes_accessed = 2 * (n * hw * (cin + cout) + cin * planes + 9 * planes * planes
                          + planes * cout + (cin * cout if has_down else 0))

    call = pl.pallas_call(
        kernel,
        out_shape=jax.ShapeDtypeStruct((n, hw, cout), jnp.bfloat16),
        grid=(n,),
        in_specs=in_specs,
        out_specs=pl.BlockSpec((None, hw, cout), lambda b: (b, 0, 0)),
        scratch_shapes=[
            pltpu.VMEM((hw, planes), jnp.bfloat16),            # conv1 output
            pltpu.VMEM((img + 3 * wp, planes), jnp.bfloat16),  # zero-padded image
            pltpu.VMEM((img, planes), jnp.bfloat16),           # wide conv2 output
            pltpu.VMEM((hw, planes), jnp.bfloat16),            # compacted conv2 output
        ],
        compiler_params=pltpu.CompilerParams(
            dimension_semantics=("parallel",),
            vmem_limit_bytes=_VMEM_LIMIT),
        cost_estimate=pl.CostEstimate(flops=flops, transcendentals=0,
                                      bytes_accessed=bytes_accessed),
    )
    return jax.jit(call)


def fused_bottleneck_block(x, p):
    n, h, w, cin = x.shape
    planes = p["conv1"]["cout"]
    cout = p["conv3"]["cout"]
    has_down = "down" in p
    assert has_down or cin == cout
    w2 = p["conv2"]["w"].reshape(9, planes, planes)
    args = [x.reshape(n, h * w, cin),
            p["conv1"]["w"], p["conv1"]["scale"].reshape(1, planes),
            p["conv1"]["bias"].reshape(1, planes),
            w2, p["conv2"]["scale"].reshape(1, planes),
            p["conv2"]["bias"].reshape(1, planes),
            p["conv3"]["w"], p["conv3"]["scale"].reshape(1, cout),
            p["conv3"]["bias"].reshape(1, cout)]
    if has_down:
        args += [p["down"]["w"], p["down"]["scale"].reshape(1, cout),
                 p["down"]["bias"].reshape(1, cout)]
    fn = _make_bottleneck(int(n), int(h), int(w), int(cin), int(planes),
                          int(cout), bool(has_down))
    return fn(*args).reshape(n, h, w, cout)


# ---------------------------------------------------------------------------
# im2col glue (only for the 7x7 stem and the three stride-2 3x3 convs)
# ---------------------------------------------------------------------------
def _im2col(x, kh, kw, stride, pad):
    n, h, w, c = x.shape
    if pad:
        x = jnp.pad(x, ((0, 0), (pad, pad), (pad, pad), (0, 0)))
    ho = (h + 2 * pad - kh) // stride + 1
    wo = (w + 2 * pad - kw) // stride + 1
    cols = []
    for dh in range(kh):
        for dw in range(kw):
            cols.append(x[:, dh:dh + stride * (ho - 1) + 1:stride,
                            dw:dw + stride * (wo - 1) + 1:stride, :])
    patches = jnp.stack(cols, axis=3)                     # (N, Ho, Wo, kh*kw, C)
    return patches.reshape(n * ho * wo, kh * kw * c), ho, wo


def conv_bn(x, p, stride, relu=True, res=None, use_pallas=True):
    kh, kw = p["ksize"]
    n, h, w, c = x.shape
    cout = p["cout"]

    if not use_pallas:                                    # independent JAX reference
        wf = p["w"][: kh * kw * c].astype(jnp.float32).reshape(kh, kw, c, cout)
        y = jax.lax.conv_general_dilated(
            x.astype(jnp.float32), wf, window_strides=(stride, stride),
            padding=[(p["pad"], p["pad"])] * 2,
            dimension_numbers=("NHWC", "HWIO", "NHWC"))
        y = y * p["scale"][None, None, None, :] + p["bias"][None, None, None, :]
        if res is not None:
            y = y + res.astype(jnp.float32)
        if relu:
            y = jnp.maximum(y, 0.0)
        return y.astype(jnp.bfloat16)

    if kh == 1:                                           # 1x1: no im2col at all
        if stride != 1:
            x = x[:, ::stride, ::stride, :]
            h, w = x.shape[1], x.shape[2]
        res2d = None if res is None else res.reshape(n * h * w, cout)
        y = fused_gemm(x.reshape(n * h * w, c), p["w"], p["scale"], p["bias"],
                       res=res2d, relu=relu)
        return y.reshape(n, h, w, cout)

    cols, ho, wo = _im2col(x, kh, kw, stride, p["pad"])   # stem / stride-2 fallback
    if cols.shape[1] < p["w"].shape[0]:                   # K padded at weight-pack time
        cols = jnp.pad(cols, ((0, 0), (0, p["w"].shape[0] - cols.shape[1])))
    res2d = None if res is None else res.reshape(n * ho * wo, cout)
    y = fused_gemm(cols, p["w"], p["scale"], p["bias"], res=res2d, relu=relu)
    return y.reshape(n, ho, wo, cout)


# ---------------------------------------------------------------------------
# MaxPool 3x3 / stride 2 / pad 1 via parity-phase decomposition (tiled over batch)
# ---------------------------------------------------------------------------
def _maxpool_kernel(p00_ref, p01_ref, p10_ref, p11_ref, o_ref):
    ho, wo, _ = o_ref.shape
    m = p00_ref[0:ho, 0:wo, :]
    m = jnp.maximum(m, p00_ref[0:ho, 1:wo + 1, :])
    m = jnp.maximum(m, p00_ref[1:ho + 1, 0:wo, :])
    m = jnp.maximum(m, p00_ref[1:ho + 1, 1:wo + 1, :])
    m = jnp.maximum(m, p01_ref[0:ho, 0:wo, :])
    m = jnp.maximum(m, p01_ref[1:ho + 1, 0:wo, :])
    m = jnp.maximum(m, p10_ref[0:ho, 0:wo, :])
    m = jnp.maximum(m, p10_ref[0:ho, 1:wo + 1, :])
    m = jnp.maximum(m, p11_ref[0:ho, 0:wo, :])
    o_ref[...] = m


@functools.lru_cache(maxsize=None)
def _make_maxpool(n, h, w, c):
    ho, wo = h // 2, w // 2
    call = pl.pallas_call(
        _maxpool_kernel,
        out_shape=jax.ShapeDtypeStruct((n, ho, wo, c), jnp.bfloat16),
        grid=(n,),
        in_specs=[pl.BlockSpec((None, ho + 1, wo + 1, c),
                               lambda b: (b, 0, 0, 0))] * 4,
        out_specs=pl.BlockSpec((None, ho, wo, c), lambda b: (b, 0, 0, 0)),
        compiler_params=pltpu.CompilerParams(
            dimension_semantics=("parallel",),
            vmem_limit_bytes=_VMEM_LIMIT),
    )

    def fn(x):
        # Padding with the finite bf16 min is safe: inputs are post-ReLU (>= 0).
        neg = float(jnp.finfo(jnp.bfloat16).min)
        xp = jnp.pad(x, ((0, 0), (1, 1), (1, 1), (0, 0)), constant_values=neg)
        phases = [xp[:, a::2, b::2, :] for a in (0, 1) for b in (0, 1)]
        return call(*phases)

    return jax.jit(fn)


def max_pool_3x3_s2(x, use_pallas=True):
    n, h, w, c = x.shape
    if not use_pallas:
        y = jax.lax.reduce_window(
            x.astype(jnp.float32), -jnp.inf, jax.lax.max,
            (1, 3, 3, 1), (1, 2, 2, 1), ((0, 0), (1, 1), (1, 1), (0, 0)))
        return y.astype(jnp.bfloat16)
    assert h % 2 == 0 and w % 2 == 0
    return _make_maxpool(int(n), int(h), int(w), int(c))(x)


# ---------------------------------------------------------------------------
# Global average pool + fc head: left to XLA (a Pallas kernel here was pure
# dispatch overhead at this size -- perf-review item).
# ---------------------------------------------------------------------------
def avgpool_fc(x, fc_w, fc_b, n_class, use_pallas=True):
    del use_pallas, n_class
    pooled = jnp.mean(x.astype(jnp.float32), axis=(1, 2))
    return pooled @ fc_w.astype(jnp.float32) + fc_b


# ---------------------------------------------------------------------------
# ResNet-50 parameters (deterministic synthetic init, Pallas-ready layout)
# ---------------------------------------------------------------------------
def _pad_ch(c):
    # Pad 64-wide channel dims to 128 so all activation blocks are lane-dense.
    return 128 if c == 64 else c


def _conv_bn_params(key, cin, cout, k, pad, cin_p=None, cout_p=None, k_rows=None):
    cin_p = cin if cin_p is None else cin_p
    cout_p = cout if cout_p is None else cout_p
    k1, k2, k3 = jax.random.split(key, 3)
    fan_in = cin * k * k
    w = jax.random.normal(k1, (k, k, cin, cout), jnp.float32) * np.sqrt(2.0 / fan_in)
    gamma = 1.0 + 0.1 * jax.random.normal(k2, (cout,), jnp.float32)
    beta = 0.1 * jax.random.normal(k3, (cout,), jnp.float32)
    eps = 1e-5
    scale = gamma / jnp.sqrt(1.0 + eps)          # BN folded (eval mode, mean=0, var=1)
    bias = beta
    # Zero-pad channels (exact: padded lanes carry zeros end to end).
    wfull = jnp.zeros((k, k, cin_p, cout_p), jnp.float32)
    wfull = wfull.at[:, :, :cin, :cout].set(w)
    wm = wfull.reshape(k * k * cin_p, cout_p)
    if k_rows is not None and k_rows > wm.shape[0]:
        wm = jnp.pad(wm, ((0, k_rows - wm.shape[0]), (0, 0)))
    scale_p = jnp.zeros((cout_p,), jnp.float32).at[:cout].set(scale)
    bias_p = jnp.zeros((cout_p,), jnp.float32).at[:cout].set(bias)
    return {"w": wm.astype(jnp.bfloat16), "scale": scale_p, "bias": bias_p,
            "ksize": (k, k), "pad": pad, "cin": cin_p, "cout": cout_p}


def _bottleneck_params(key, inplanes, planes, stride, downsample):
    keys = jax.random.split(key, 4)
    p = {"conv1": _conv_bn_params(keys[0], inplanes, planes, 1, 0,
                                  cin_p=_pad_ch(inplanes), cout_p=_pad_ch(planes)),
         "conv2": _conv_bn_params(keys[1], planes, planes, 3, 1,
                                  cin_p=_pad_ch(planes), cout_p=_pad_ch(planes)),
         "conv3": _conv_bn_params(keys[2], planes, planes * 4, 1, 0,
                                  cin_p=_pad_ch(planes), cout_p=planes * 4),
         "stride": stride}
    if downsample:
        p["down"] = _conv_bn_params(keys[3], inplanes, planes * 4, 1, 0,
                                    cin_p=_pad_ch(inplanes), cout_p=planes * 4)
    return p


def make_resnet50_params(key, n_class):
    keys = jax.random.split(key, 8)
    params = {"stem": _conv_bn_params(keys[0], 3, 64, 7, 3,
                                      cout_p=_pad_ch(64), k_rows=256)}
    cfg = [(64, 3, 1), (128, 4, 2), (256, 6, 2), (512, 3, 2)]   # ResNet-50
    inplanes = 64
    layers = []
    for li, (planes, nblocks, stride) in enumerate(cfg):
        bkeys = jax.random.split(keys[1 + li], nblocks)
        blocks = []
        for bi in range(nblocks):
            s = stride if bi == 0 else 1
            ds = (bi == 0) and (s != 1 or inplanes != planes * 4)
            blocks.append(_bottleneck_params(bkeys[bi], inplanes, planes, s, ds))
            inplanes = planes * 4
        layers.append(blocks)
    params["layers"] = layers
    kfc1, kfc2 = jax.random.split(keys[5], 2)
    params["fc_w"] = jax.random.normal(kfc1, (2048, n_class), jnp.float32) / np.sqrt(2048.0)
    params["fc_b"] = 0.01 * jax.random.normal(kfc2, (n_class,), jnp.float32)
    return params


def bottleneck(x, p, use_pallas=True):
    if use_pallas and p["stride"] == 1:
        return fused_bottleneck_block(x, p)
    identity = x
    out = conv_bn(x, p["conv1"], 1, relu=True, use_pallas=use_pallas)
    out = conv_bn(out, p["conv2"], p["stride"], relu=True, use_pallas=use_pallas)
    if "down" in p:
        identity = conv_bn(x, p["down"], p["stride"], relu=False,
                           use_pallas=use_pallas)
    out = conv_bn(out, p["conv3"], 1, relu=True, res=identity,
                  use_pallas=use_pallas)
    return out


def cassva_forward(x_nchw, params, n_class, use_pallas=True):
    # incoming x is NCHW (PyTorch convention); transpose to NHWC, store bf16.
    x = jnp.transpose(x_nchw, (0, 2, 3, 1)).astype(jnp.bfloat16)
    x = conv_bn(x, params["stem"], 2, relu=True, use_pallas=use_pallas)
    x = max_pool_3x3_s2(x, use_pallas=use_pallas)
    for blocks in params["layers"]:
        for bp in blocks:
            x = bottleneck(x, bp, use_pallas=use_pallas)
    return avgpool_fc(x, params["fc_w"], params["fc_b"], n_class,
                      use_pallas=use_pallas)


if __name__ == "__main__":
    key = jax.random.PRNGKey(0)
    pkey, xkey = jax.random.split(key)
    n_class = 5
    params = make_resnet50_params(pkey, n_class)
    x = jax.random.normal(xkey, (2, 3, 64, 64), jnp.float32)   # NCHW, like PyTorch

    logits = cassva_forward(x, params, n_class, use_pallas=True)
    logits = jax.block_until_ready(logits)

    ref = cassva_forward(x, params, n_class, use_pallas=False)
    ref = jax.block_until_ready(ref)

    assert logits.shape == (2, n_class)
    rel_err = float(jnp.max(jnp.abs(logits - ref)) /
                    (jnp.max(jnp.abs(ref)) + 1e-6))
    assert rel_err < 2.5e-2, f"Pallas vs JAX reference mismatch: rel_err={rel_err}"
    print("KERNEL_OK")
</pallas_src>

<mosaic_0001>
module attributes {stable_mosaic.version = 11 : i64} {
  func.func @_gemm_kernel(%arg0: i32, %arg1: i32, %arg2: memref<1024x256xbf16, #tpu.memory_space<vmem>>, %arg3: memref<256x128xbf16, #tpu.memory_space<vmem>>, %arg4: memref<1x128xf32, #tpu.memory_space<vmem>>, %arg5: memref<1x128xf32, #tpu.memory_space<vmem>>, %arg6: memref<1024x128xbf16, #tpu.memory_space<vmem>>) attributes {dimension_semantics = [#tpu.dimension_semantics<parallel>, #tpu.dimension_semantics<parallel>], iteration_bounds = array<i64: 2, 1>, scalar_prefetch = 0 : i64, scratch_operands = 0 : i64, tpu.core_type = #tpu.core_type<tc>, window_params = [{transform_indices = @transform_0, window_bounds = array<i64: 1024, 256>}, {transform_indices = @transform_1, window_bounds = array<i64: 256, 128>}, {transform_indices = @transform_2, window_bounds = array<i64: 1, 128>}, {transform_indices = @transform_3, window_bounds = array<i64: 1, 128>}, {transform_indices = @transform_4, window_bounds = array<i64: 1024, 128>}]} {
    %c0 = arith.constant 0 : index
    %c0_0 = arith.constant 0 : index
    %0 = vector.load %arg2[%c0, %c0_0] : memref<1024x256xbf16, #tpu.memory_space<vmem>>, vector<1024x256xbf16>
    %c0_1 = arith.constant 0 : index
    %c0_2 = arith.constant 0 : index
    %1 = vector.load %arg3[%c0_1, %c0_2] : memref<256x128xbf16, #tpu.memory_space<vmem>>, vector<256x128xbf16>
    %cst = arith.constant dense<0.000000e+00> : vector<1024x128xf32>
    %2 = tpu.matmul %0, %1, %cst {dimension_numbers = #tpu.dot_dimension_numbers<[1], [0], [0], [1], [0, 0, 1, 1], [], []>} : vector<1024x256xbf16>, vector<256x128xbf16>, vector<1024x128xf32> -> vector<1024x128xf32>
    %c0_3 = arith.constant 0 : index
    %c0_4 = arith.constant 0 : index
    %3 = vector.load %arg4[%c0_3, %c0_4] : memref<1x128xf32, #tpu.memory_space<vmem>>, vector<1x128xf32>
    %4 = vector.broadcast %3 : vector<1x128xf32> to vector<1024x128xf32>
    %5 = arith.mulf %2, %4 : vector<1024x128xf32>
    %c0_5 = arith.constant 0 : index
    %c0_6 = arith.constant 0 : index
    %6 = vector.load %arg5[%c0_5, %c0_6] : memref<1x128xf32, #tpu.memory_space<vmem>>, vector<1x128xf32>
    %7 = vector.broadcast %6 : vector<1x128xf32> to vector<1024x128xf32>
    %8 = arith.addf %5, %7 : vector<1024x128xf32>
    %cst_7 = arith.constant 0.000000e+00 : f32
    %9 = vector.broadcast %cst_7 : f32 to vector<1024x128xf32>
    %10 = arith.maximumf %8, %9 : vector<1024x128xf32>
    %11 = arith.truncf %10 : vector<1024x128xf32> to vector<1024x128xbf16>
    %c0_8 = arith.constant 0 : index
    %c0_9 = arith.constant 0 : index
    %12 = vector.load %arg6[%c0_8, %c0_9] : memref<1024x128xbf16, #tpu.memory_space<vmem>>, vector<1024x128xbf16>
    tpu.vector_store %arg6[%c0_8, %c0_9], %11 {strides = array<i32>} : memref<1024x128xbf16, #tpu.memory_space<vmem>>, vector<1024x128xbf16>,
    return
  }
  func.func @transform_0(%arg0: i32, %arg1: i32) -> (i32, i32) {
    %c0_i32 = arith.constant 0 : i32
    %c0_i32_0 = arith.constant 0 : i32
    return %arg0, %c0_i32 : i32, i32
  }
  func.func @transform_1(%arg0: i32, %arg1: i32) -> (i32, i32) {
    %c0_i32 = arith.constant 0 : i32
    %c0_i32_0 = arith.constant 0 : i32
    return %c0_i32, %arg1 : i32, i32
  }
  func.func @transform_2(%arg0: i32, %arg1: i32) -> (i32, i32) {
    %c0_i32 = arith.constant 0 : i32
    %c0_i32_0 = arith.constant 0 : i32
    return %c0_i32, %arg1 : i32, i32
  }
  func.func @transform_3(%arg0: i32, %arg1: i32) -> (i32, i32) {
    %c0_i32 = arith.constant 0 : i32
    %c0_i32_0 = arith.constant 0 : i32
    return %c0_i32, %arg1 : i32, i32
  }
  func.func @transform_4(%arg0: i32, %arg1: i32) -> (i32, i32) {
    %c0_i32 = arith.constant 0 : i32
    return %arg0, %arg1 : i32, i32
  }
}

</mosaic_0001>

<bundles_post_ra>
// kernel: fn.1
= control target key start
LH: loop header
LB: loop body
LE: loop exit
PB: predicated region body
PF: predicated region fallthrough
CT: control target
= control target key end

     0   :  { %9 = vsyncpa [#allocation3], 0  ;;  %s4933_s0 = inlined_call_operand.hbm [shape: bf16[2048,256], index: 0, kind: input, shape index: {}]   ;;  %s4934_s1 = inlined_call_operand.hbm [shape: bf16[256,128], index: 1, kind: input, shape index: {}]   ;;  %s4935_s2 = inlined_call_operand.vmem [shape: f32[1,128], index: 2, kind: input, shape index: {}]   ;;  %s4936_s3 = inlined_call_operand.vmem [shape: f32[1,128], index: 3, kind: input, shape index: {}]   ;;  %s4937_s4 = inlined_call_operand.hbm [shape: bf16[2048,128], index: 4, kind: output, shape index: {}]  }
   0x1   :  { %11 = vsyncpa [#allocation3 + $0x1], 0 }
   0x2   :  { %12 = vsyncpa [#allocation6], 0 }
   0x3   :  { %13 = vsyncpa [#allocation4], 0 }
   0x4   :  { %15 = vsyncpa [#allocation4 + $0x1], 0  ;;  %s4208_s15 = smov 0   ;;  %s4210_s16 = smov 0  }
   0x5   :  { %s4212_s17 = smov 0   ;;  %s4214_s18 = smov 0  }
   0x6   :  { %s4216_s19 = smov 0   ;;  %s4218_s20 = smov 0  }
   0x7 LB: > { %s2897_s21 = sadd.s32 4294967295, %s4171_s20   ;;  %s2898_s22 = sadd.s32 4294967294, %s4171_s20   ;;  %s4171_s20 = sphi %s4218_s20, %s21_s20   ;;  %s4167_s19 = sphi %s4216_s19, %s4961_s19   ;;  %s4163_s18 = sphi %s4214_s18, %s4960_s18   ;;  %s4159_s17 = sphi %s4212_s17, %s4959_s17   ;;  %s4155_s16 = sphi %s4210_s16, %s4958_s16   ;;  %s4151_s15 = sphi %s4208_s15, %s4957_s15  }
   0x8   : > { %p53_p0 = scmp.ne.s32.totalorder %s4155_s16, %s4151_s15  ;;  %p4242_p1 = scmp.eq.s32.totalorder %s2897_s21, 0 }
   0x9   : > { %p4246_p2 = scmp.eq.s32.totalorder %s2897_s21, 1  ;;  %p163_p3 = scmp.eq.s32.totalorder %s2898_s22, 1 }
   0xa   : > { %s4942_s23 = scalar_select %p4242_p1, 1, 0 }
   0xb   : > { %s4943_s24 = scalar_select %p4246_p2, 1, 0 }
   0xc   : > { %p4252_p4 = por %p4242_p1, %p53_p0  ;;  %p2899_p5 = scmp.ge.s32.totalorder %s4171_s20, 1 }
   0xd   : > { %p4257_p6 = por %p163_p3, %p53_p0  ;;  %p170_p7 = scmp.lt.s32.totalorder %s4171_s20, 3 }
   0xe   : > { %s4944_s25 = scalar_select %p4252_p4, 1, 0 }
   0xf   : > { %s4945_s26 = scalar_select %p4257_p6, 1, 0 }
  0x10   : > { %p4262_p8 = pnand %p2899_p5, %p170_p7  ;;  %s4173_s28 = smov [#allocation5]  }
  0x11   : > { %s184_s29 = sshll.u32 %s4173_s28, 4  ;;  %s33_s5 = sadd.s32 1, %s4167_s19  ;;  %s185_s29 = int_to_ptr.vmem [resolvable:$true] %s184_s29 }
  0x12   : > { %s4946_s27 = scalar_select %p4262_p8, 1, 0 }
  0x13   : > { %p3745_p9 = pneg %p4262_p8  ;;  %s4027_s8 = scalar_lea.hbm %s4934_s1, 2048 }
  0x14   : > { %p4028_p12 = scmp.ne.s32.totalorder %s4934_s1, %s4027_s8  ;;  %p4034_p5 = scmp.lt.u32.totalorder %s4027_s8, %s4934_s1 }
  0x15   : > { %p4271_p11 = pnand %p3745_p9, %p4242_p1 }
  0x17   : > { %p4029_p13 = pneg %p4271_p11 }
  0x19   : > { %p4030_p0 = pnand %p4029_p13, %p4028_p12 }
  0x1b   : > { %p4031_p3 = pneg %p4030_p0 }
  0x1d   : > { %p4036_p7 = pnand %p4034_p5, %p4031_p3 }
  0x1f   : > { %4039 = shalt.err (!%p4036_p7)
}
  0x20   : > { %s4040_s13 = scalar_lea.vmem %s185_s29, 2048  ;;  %p4048_p1 = scmp.lt.s32.totalorder %s185_s29, %s185_s29 }
  0x21   : > { %p4041_p9 = scmp.ne.s32.totalorder %s185_s29, %s4040_s13  ;;  %p4049_p4 = scmp.lt.s32.totalorder %s4040_s13, %s4040_s13 }
  0x23   : > { %p4043_p10 = pnand %p4041_p9, %p4029_p13  ;;  %p4050_p8 = por %p4049_p4, %p4048_p1 }
  0x25   : > { %p4044_p6 = pneg %p4043_p10 }
  0x27   : > { %p4051_p2 = pnand %p4050_p8, %p4044_p6 }
  0x29   : > { %4054 = shalt.err (!%p4051_p2)
}
  0x2a   : > { %s4174_s14 = smov 64   ;;  %s4175_s21 = smov 4  }
  0x2b   : > { %3748 = dma.hbm_to_vmem [thread:$0]  (!%p4271_p11), %s4934_s1, 2048, %s185_s29, [#allocation6], %s4174_s14, %s4174_s14, %s4175_s21  }
  0x2c   : > { %p35_p1 = scmp.ge.s32.totalorder %s33_s5, 2  ;;  %s40_s6 = sadd.s32 1, %s4159_s17 }
  0x2d   : > { %p47_p2 = scmp.ne.s32.totalorder %s4159_s17, %s4155_s16  ;;  %p48_p4 = scmp.eq.s32.totalorder %s4171_s20, 0 }
  0x2e   : > { %s4963_s5 = smov (%p35_p1, %s33_s5), 0  ;;  %p4949_p8 = scmp.ne.s32.totalorder %s4943_s24, 0 }
  0x2f   : > { %p4298_p6 = por %p48_p4, %p47_p2  ;;  %s37_s30 = ssub.s32 %s4167_s19, %s4963_s5 }
  0x30   : > { %p4304_p10 = por %p4949_p8, %p47_p2  ;;  %p3758_p12 = scmp.lt.s32.totalorder %s4171_s20, 2 }
  0x31   : > { %p38_p11 = scmp.eq.s32.totalorder %s37_s30, 0  ;;  %s210_s29 = sand.u32 1, %s4159_s17  }
  0x32   : > { %s2904_s9 = sshll.u32 %s210_s29, 10  ;;  %s3192_s11 = sshll.u32 %s4167_s19, 14 }
  0x33   : > { %s4313_s10 = scalar_select %p38_p11, %s4159_s17, %s40_s6  }
  0x34   : > { %s4319_s14 = scalar_lea.hbm %s4933_s0, %s3192_s11  ;;  %s214_s24 = scalar_lea.vmem [#allocation2], %s2904_s9 }
  0x35   : > { %s222_s21 = sshll.u32 %s214_s24, 4  ;;  %p4325_p13 = pnand %p3758_p12, %p4298_p6  ;;  %s4321_s21 = int_to_ptr.vmem [resolvable:$true] %s222_s21 }
  0x36   : > { %s4329_s28 = scalar_lea.sflag [#allocation3], %s210_s29  ;;  %s4055_s6 = scalar_lea.hbm %s4319_s14, 16384 }
  0x37   : > { %p4056_p0 = scmp.ne.s32.totalorder %s4319_s14, %s4055_s6  ;;  %p4057_p3 = pneg %p4325_p13 }
  0x38   : > { %s4060_s7 = scalar_lea.hbm %s4933_s0, 32768  ;;  %p4061_p9 = scmp.lt.u32.totalorder %s4319_s14, %s4933_s0 }
  0x39   : > { %p4058_p5 = pnand %p4057_p3, %p4056_p0  ;;  %p4062_p1 = scmp.lt.u32.totalorder %s4060_s7, %s4055_s6 }
  0x3a   : > { %p4064_p4 = scmp.lt.u32.totalorder %s4055_s6, %s4319_s14 }
  0x3b   : > { %p4059_p7 = pneg %p4058_p5  ;;  %p4063_p2 = por %p4062_p1, %p4061_p9 }
  0x3d   : > { %p4065_p6 = por %p4064_p4, %p4063_p2 }
  0x3f   : > { %p4066_p8 = pnand %p4065_p6, %p4059_p7 }
  0x41   : > { %4069 = shalt.err (!%p4066_p8)
}
  0x42   : > { %s4070_s29 = scalar_lea.vmem %s4321_s21, 16384  ;;  %s4176_s13 = smov [#allocation2]  }
  0x43   : > { %p4071_p12 = scmp.ne.s32.totalorder %s4321_s21, %s4070_s29  ;;  %s4075_s24 = sshll.u32 %s4176_s13, 4  ;;  %s4076_s24 = int_to_ptr.vmem [resolvable:$false] %s4075_s24 }
  0x44   : > { %s4077_s30 = scalar_lea.vmem %s4076_s24, 32768  ;;  %p4078_p5 = scmp.lt.s32.totalorder %s4321_s21, %s4076_s24 }
  0x45   : > { %p4073_p11 = pnand %p4071_p12, %p4057_p3  ;;  %p4079_p9 = scmp.lt.s32.totalorder %s4077_s30, %s4070_s29 }
  0x47   : > { %p4074_p0 = pneg %p4073_p11  ;;  %p4080_p1 = por %p4079_p9, %p4078_p5 }
  0x49   : > { %p4081_p2 = pnand %p4080_p1, %p4074_p0 }
  0x4b   : > { %4084 = shalt.err (!%p4081_p2)
}
  0x4c   : > { %s4177_s6 = smov 128   ;;  %s4178_s9 = smov 8  }
  0x4d   : > { %3752 = dma.hbm_to_vmem [thread:$0]  (!%p4325_p13), %s4319_s14, 16384, %s4321_s21, %s4329_s28, %s4177_s6, %s4177_s6, %s4178_s9  }
  0x4e   : > { %p4952_p3 = scmp.ne.s32.totalorder %s4946_s27, 0 }
  0x4f   : > { %s4360_s7 = sand.u32 (!%p4952_p3), 1, %s4155_s16   ;;  %p4953_p7 = scmp.ne.s32.totalorder (!%p4952_p3), %s4944_s25, 0 }
  0x50   : > { %234 = sbr.rel (%p4952_p3) target bundleno = 642 (0x282), region = 36  ;;  %s2909_s11 = sshll.u32 (!%p4952_p3), %s4360_s7, 10 }
  0x51   : > { %s237_s12 = scalar_lea.sflag (!%p4952_p3), [#allocation3], %s4360_s7  ;;  %s4364_s29 = scalar_lea.vmem (!%p4952_p3), [#allocation2], %s2909_s11 }
  0x57   : > { %4138 = dma.done.wait (%p4953_p7), %s237_s12, 16384  }
  0x58   : > { %4140 = vsyncadd (%p4953_p7), %s237_s12, 4294950912  ;;  %p4954_p13 = scmp.ne.s32.totalorder %s4942_s23, 0 }
  0x5a   : > { %4142 = dma.done.wait (%p4954_p13), [#allocation6], 2048  }
  0x5b   : > { %4144 = vsyncadd (%p4954_p13), [#allocation6], 4294965248  ;;  %v4179_v0 = vmov 0   ;;  %v3817_v1 = vld [vmem:[#allocation5] sm:$0xff]   ;;  %v3818_v2 = vld [vmem:[#allocation5 + $0x8] sm:$0xff]   ;;  %s2911_s21 = sshll.u32 %s4360_s7, 9 }
  0x5c   : > { %1180 = vmatprep.subr.bf16.mxu0 %v4179_v0  ;;  %3705 = vmatprep.subr.bf16.mxu1 %v4179_v0  ;;  %v3819_v3 = vld [vmem:[#allocation5 + $0x10] sm:$0xff]   ;;  %v3820_v4 = vld [vmem:[#allocation5 + $0x18] sm:$0xff]   ;;  %v3821_v5 = vld [vmem:[#allocation5 + $0x20] sm:$0xff]   ;;  %s4545_s22 = scalar_lea.vmem [#allocation7], %s2911_s21  ;;  %s3321_s6 = sshll.u32 %s4163_s18, 13 }
  0x5d   : > { %1181 = vmatpush1.bf16.msra.mxu0 %v3817_v1  ;;  %3721 = vmatpush1.bf16.msra.mxu1 %v3817_v1  ;;  %v3835_v6 = vld [vmem:[%s4364_s29 + $0x4] ss:$8 sps:$4 sm:$0xff]   ;;  %v3823_v9 = vld [vmem:[#allocation5 + $0x30] sm:$0xff]   ;;  %v3824_v10 = vld [vmem:[#allocation5 + $0x38] sm:$0xff]   ;;  %s2778_s9 = sshll.u32 %s4545_s22, 4  ;;  %s2764_s18 = scalar_lea.sflag [#allocation4], %s4360_s7  ;;  %s4882_s9 = int_to_ptr.vmem [resolvable:$true] %s2778_s9 }
  0x5e   : > { %1182 = vmatprep.subr.bf16.mxu0 %v4179_v0  ;;  %3706 = vmatprep.subr.bf16.mxu1 %v4179_v0  ;;  %v3822_v7 = vld [vmem:[#allocation5 + $0x28] sm:$0xff]   ;;  %v3825_v11 = vld [vmem:[#allocation5 + $0x40] sm:$0xff]   ;;  %v3827_v13 = vld [vmem:[#allocation5 + $0x50] sm:$0xff]   ;;  %s4085_s23 = scalar_lea.vmem %s4882_s9, 8192  ;;  %s4180_s25 = smov [#allocation7]  }
  0x5f   : > { %v3838_v8 = vld [vmem:[%s4364_s29 + $0x204] ss:$8 sps:$4 sm:$0xff]   ;;  %1212 = vmatprep.mubr.bf16.mxu0 %v3835_v6  ;;  %v3828_v14 = vld [vmem:[#allocation5 + $0x58] sm:$0xff]   ;;  %v3831_v17 = vld [vmem:[#allocation5 + $0x70] sm:$0xff]   ;;  %p4086_p4 = scmp.ne.s32.totalorder %s4882_s9, %s4085_s23  ;;  %s4089_s27 = sshll.u32 %s4180_s25, 4  ;;  %s4090_s27 = int_to_ptr.vmem [resolvable:$false] %s4089_s27 }
  0x60   : > { %1468 = vmatprep.mubr.bf16.mxu1 %v3838_v8  ;;  %v3826_v12 = vld [vmem:[#allocation5 + $0x48] sm:$0xff]   ;;  %v3829_v15 = vld [vmem:[#allocation5 + $0x60] sm:$0xff]   ;;  %v3832_v18 = vld [vmem:[#allocation5 + $0x78] sm:$0xff]   ;;  %s4091_s14 = scalar_lea.vmem %s4090_s27, 16384  ;;  %p4092_p12 = scmp.lt.s32.totalorder %s4882_s9, %s4090_s27 }
  0x61   : > { %1183 = vmatpush1.bf16.msra.mxu0 %v3818_v2  ;;  %3722 = vmatpush1.bf16.msra.mxu1 %v3818_v2  ;;  %v3830_v16 = vld [vmem:[#allocation5 + $0x68] sm:$0xff]   ;;  %v3839_v21 = vld [vmem:[%s4364_s29 + $0x14] ss:$8 sps:$4 sm:$0xff]   ;;  %v3843_v23 = vld [vmem:[%s4364_s29 + $0x10] ss:$8 sps:$4 sm:$0xff]   ;;  %p4087_p6 = pnand %p4086_p4, %p4304_p10  ;;  %p4093_p11 = scmp.lt.s32.totalorder %s4091_s14, %s4085_s23 }
  0x62   : > { %1184 = vmatprep.subr.bf16.mxu0 %v4179_v0  ;;  %3707 = vmatprep.subr.bf16.mxu1 %v4179_v0  ;;  %v3833_v19 = vld [vmem:[%s4364_s29] ss:$8 sps:$4 sm:$0xff]   ;;  %v3841_v22 = vld [vmem:[%s4364_s29 + $0x214] ss:$8 sps:$4 sm:$0xff]   ;;  %v3844_v24 = vld [vmem:[%s4364_s29 + $0x210] ss:$8 sps:$4 sm:$0xff]  }
  0x63   : > { %v3836_v20 = vld [vmem:[%s4364_s29 + $0x200] ss:$8 sps:$4 sm:$0xff]   ;;  %v3845_v25 = vld [vmem:[%s4364_s29 + $0x24] ss:$8 sps:$4 sm:$0xff]   ;;  %v3851_v29 = vld [vmem:[%s4364_s29 + $0x34] ss:$8 sps:$4 sm:$0xff]   ;;  %p4088_p8 = pneg %p4087_p6  ;;  %p4094_p0 = por %p4093_p11, %p4092_p12 }
  0x64   : > { %v3847_v26 = vld [vmem:[%s4364_s29 + $0x224] ss:$8 sps:$4 sm:$0xff]   ;;  %v3849_v27 = vld [vmem:[%s4364_s29 + $0x20] ss:$8 sps:$4 sm:$0xff]   ;;  %v3853_v30 = vld [vmem:[%s4364_s29 + $0x234] ss:$8 sps:$4 sm:$0xff]  }
  0x65   : > { %1185 = vmatpush1.bf16.msra.mxu0 %v3819_v3  ;;  %3723 = vmatpush1.bf16.msra.mxu1 %v3819_v3  ;;  %v3850_v28 = vld [vmem:[%s4364_s29 + $0x220] ss:$8 sps:$4 sm:$0xff]   ;;  %v3855_v31 = vld [vmem:[%s4364_s29 + $0x30] ss:$8 sps:$4 sm:$0xff]   ;;  %v3857_v33 = vld [vmem:[%s4364_s29 + $0x44] ss:$8 sps:$4 sm:$0xff]   ;;  %p4095_p5 = pnand %p4094_p0, %p4088_p8 }
  0x66   : > { %1186 = vmatprep.subr.bf16.mxu0 %v4179_v0  ;;  %3708 = vmatprep.subr.bf16.mxu1 %v4179_v0  ;;  %v3856_v32 = vld [vmem:[%s4364_s29 + $0x230] ss:$8 sps:$4 sm:$0xff]   ;;  %v3859_v34 = vld [vmem:[%s4364_s29 + $0x244] ss:$8 sps:$4 sm:$0xff]   ;;  %v3861_v35 = vld [vmem:[%s4364_s29 + $0x40] ss:$8 sps:$4 sm:$0xff]  }
  0x67   : > { %v3862_v36 = vld [vmem:[%s4364_s29 + $0x240] ss:$8 sps:$4 sm:$0xff]   ;;  %v3863_v37 = vld [vmem:[%s4364_s29 + $0x54] ss:$8 sps:$4 sm:$0xff]   ;;  %v3867_v39 = vld [vmem:[%s4364_s29 + $0x50] ss:$8 sps:$4 sm:$0xff]  }
  0x68   : > { %v3865_v38 = vld [vmem:[%s4364_s29 + $0x254] ss:$8 sps:$4 sm:$0xff]   ;;  %v3868_v40 = vld [vmem:[%s4364_s29 + $0x250] ss:$8 sps:$4 sm:$0xff]   ;;  %v3869_v41 = vld [vmem:[%s4364_s29 + $0x64] ss:$8 sps:$4 sm:$0xff]  }
  0x69   : > { %1187 = vmatpush1.bf16.msra.mxu0 %v3820_v4  ;;  %3724 = vmatpush1.bf16.msra.mxu1 %v3820_v4  ;;  %v3871_v42 = vld [vmem:[%s4364_s29 + $0x264] ss:$8 sps:$4 sm:$0xff]   ;;  %v3873_v43 = vld [vmem:[%s4364_s29 + $0x60] ss:$8 sps:$4 sm:$0xff]   ;;  %v3875_v45 = vld [vmem:[%s4364_s29 + $0x74] ss:$8 sps:$4 sm:$0xff]  }
  0x6a   : > { %1188 = vmatprep.subr.bf16.mxu0 %v4179_v0  ;;  %3709 = vmatprep.subr.bf16.mxu1 %v4179_v0  ;;  %v3874_v44 = vld [vmem:[%s4364_s29 + $0x260] ss:$8 sps:$4 sm:$0xff]   ;;  %v3877_v46 = vld [vmem:[%s4364_s29 + $0x274] ss:$8 sps:$4 sm:$0xff]   ;;  %v3879_v47 = vld [vmem:[%s4364_s29 + $0x70] ss:$8 sps:$4 sm:$0xff]  }
  0x6b   : > { %v3880_v48 = vld [vmem:[%s4364_s29 + $0x270] ss:$8 sps:$4 sm:$0xff]   ;;  %v3881_v49 = vld [vmem:[%s4364_s29 + $0x84] ss:$8 sps:$4 sm:$0xff]   ;;  %v3885_v51 = vld [vmem:[%s4364_s29 + $0x80] ss:$8 sps:$4 sm:$0xff]  }
  0x6c   : > { %v3883_v50 = vld [vmem:[%s4364_s29 + $0x284] ss:$8 sps:$4 sm:$0xff]   ;;  %v3886_v52 = vld [vmem:[%s4364_s29 + $0x280] ss:$8 sps:$4 sm:$0xff]   ;;  %v3887_v53 = vld [vmem:[%s4364_s29 + $0x94] ss:$8 sps:$4 sm:$0xff]  }
  0x6d   : > { %1189 = vmatpush1.bf16.msra.mxu0 %v3821_v5  ;;  %3725 = vmatpush1.bf16.msra.mxu1 %v3821_v5  ;;  %v3889_v54 = vld [vmem:[%s4364_s29 + $0x294] ss:$8 sps:$4 sm:$0xff]   ;;  %v3891_v55 = vld [vmem:[%s4364_s29 + $0x90] ss:$8 sps:$4 sm:$0xff]   ;;  %v3893_v57 = vld [vmem:[%s4364_s29 + $0xa4] ss:$8 sps:$4 sm:$0xff]  }
  0x6e   : > { %1190 = vmatprep.subr.bf16.mxu0 %v4179_v0  ;;  %3710 = vmatprep.subr.bf16.mxu1 %v4179_v0  ;;  %v3892_v56 = vld [vmem:[%s4364_s29 + $0x290] ss:$8 sps:$4 sm:$0xff]   ;;  %v3895_v58 = vld [vmem:[%s4364_s29 + $0x2a4] ss:$8 sps:$4 sm:$0xff]   ;;  %v3897_v59 = vld [vmem:[%s4364_s29 + $0xa0] ss:$8 sps:$4 sm:$0xff]  }
  0x6f   : > { %v3898_v60 = vld [vmem:[%s4364_s29 + $0x2a0] ss:$8 sps:$4 sm:$0xff]   ;;  %v3899_v61 = vld [vmem:[%s4364_s29 + $0xb4] ss:$8 sps:$4 sm:$0xff]   ;;  %v3903_v63 = vld [vmem:[%s4364_s29 + $0xb0] ss:$8 sps:$4 sm:$0xff]  }
  0x70   : > { %v3901_v62 = vld [vmem:[%s4364_s29 + $0x2b4] ss:$8 sps:$4 sm:$0xff]   ;;  %v3905_v1 = vld [vmem:[%s4364_s29 + $0xc4] ss:$8 sps:$4 sm:$0xff]   ;;  %v3909_v3 = vld [vmem:[%s4364_s29 + $0xc0] ss:$8 sps:$4 sm:$0xff]  }
  0x71   : > { %1191 = vmatpush1.bf16.msra.mxu0 %v3822_v7  ;;  %3726 = vmatpush1.bf16.msra.mxu1 %v3822_v7  ;;  %v3907_v2 = vld [vmem:[%s4364_s29 + $0x2c4] ss:$8 sps:$4 sm:$0xff]   ;;  %v3910_v4 = vld [vmem:[%s4364_s29 + $0x2c0] ss:$8 sps:$4 sm:$0xff]   ;;  %v3911_v5 = vld [vmem:[%s4364_s29 + $0xd4] ss:$8 sps:$4 sm:$0xff]  }
  0x72   : > { %1192 = vmatprep.subr.bf16.mxu0 %v4179_v0  ;;  %3711 = vmatprep.subr.bf16.mxu1 %v4179_v0  ;;  %v3913_v6 = vld [vmem:[%s4364_s29 + $0x2d4] ss:$8 sps:$4 sm:$0xff]   ;;  %v3915_v7 = vld [vmem:[%s4364_s29 + $0xd0] ss:$8 sps:$4 sm:$0xff]  }
  0x73   : > { %v3916_v8 = vld [vmem:[%s4364_s29 + $0x2d0] ss:$8 sps:$4 sm:$0xff]  }
  0x75   : > { %1193 = vmatpush1.bf16.msra.mxu0 %v3823_v9  ;;  %3727 = vmatpush1.bf16.msra.mxu1 %v3823_v9  ;;  %v3917_v9 = vld [vmem:[%s4364_s29 + $0xe4] ss:$8 sps:$4 sm:$0xff]  }
  0x76   : > { %1194 = vmatprep.subr.bf16.mxu0 %v4179_v0  ;;  %3712 = vmatprep.subr.bf16.mxu1 %v4179_v0 }
  0x79   : > { %1195 = vmatpush1.bf16.msra.mxu0 %v3824_v10  ;;  %3728 = vmatpush1.bf16.msra.mxu1 %v3824_v10  ;;  %v3919_v10 = vld [vmem:[%s4364_s29 + $0x2e4] ss:$8 sps:$4 sm:$0xff]  }
  0x7a   : > { %1196 = vmatprep.subr.bf16.mxu0 %v4179_v0  ;;  %3713 = vmatprep.subr.bf16.mxu1 %v4179_v0 }
  0x7d   : > { %1197 = vmatpush1.bf16.msra.mxu0 %v3825_v11  ;;  %3729 = vmatpush1.bf16.msra.mxu1 %v3825_v11  ;;  %v3921_v11 = vld [vmem:[%s4364_s29 + $0xe0] ss:$8 sps:$4 sm:$0xff]  }
  0x7e   : > { %1198 = vmatprep.subr.bf16.mxu0 %v4179_v0  ;;  %3714 = vmatprep.subr.bf16.mxu1 %v4179_v0 }
  0x81   : > { %1199 = vmatpush1.bf16.msra.mxu0 %v3826_v12  ;;  %3730 = vmatpush1.bf16.msra.mxu1 %v3826_v12  ;;  %v3922_v12 = vld [vmem:[%s4364_s29 + $0x2e0] ss:$8 sps:$4 sm:$0xff]  }
  0x82   : > { %1200 = vmatprep.subr.bf16.mxu0 %v4179_v0  ;;  %3715 = vmatprep.subr.bf16.mxu1 %v4179_v0 }
  0x85   : > { %1201 = vmatpush1.bf16.msra.mxu0 %v3827_v13  ;;  %3731 = vmatpush1.bf16.msra.mxu1 %v3827_v13  ;;  %v3923_v13 = vld [vmem:[%s4364_s29 + $0xf4] ss:$8 sps:$4 sm:$0xff]  }
  0x86   : > { %1202 = vmatprep.subr.bf16.mxu0 %v4179_v0  ;;  %3716 = vmatprep.subr.bf16.mxu1 %v4179_v0 }
  0x89   : > { %1203 = vmatpush1.bf16.msra.mxu0 %v3828_v14  ;;  %3732 = vmatpush1.bf16.msra.mxu1 %v3828_v14  ;;  %v3925_v14 = vld [vmem:[%s4364_s29 + $0x2f4] ss:$8 sps:$4 sm:$0xff]  }
  0x8a   : > { %1204 = vmatprep.subr.bf16.mxu0 %v4179_v0  ;;  %3717 = vmatprep.subr.bf16.mxu1 %v4179_v0 }
  0x8d   : > { %1205 = vmatpush1.bf16.msra.mxu0 %v3829_v15  ;;  %3733 = vmatpush1.bf16.msra.mxu1 %v3829_v15  ;;  %v3927_v15 = vld [vmem:[%s4364_s29 + $0xf0] ss:$8 sps:$4 sm:$0xff]  }
  0x8e   : > { %1206 = vmatprep.subr.bf16.mxu0 %v4179_v0  ;;  %3718 = vmatprep.subr.bf16.mxu1 %v4179_v0 }
  0x91   : > { %1207 = vmatpush1.bf16.msra.mxu0 %v3830_v16  ;;  %3734 = vmatpush1.bf16.msra.mxu1 %v3830_v16  ;;  %v3928_v16 = vld [vmem:[%s4364_s29 + $0x2f0] ss:$8 sps:$4 sm:$0xff]  }
  0x92   : > { %1208 = vmatprep.subr.bf16.mxu0 %v4179_v0  ;;  %3719 = vmatprep.subr.bf16.mxu1 %v4179_v0 }
  0x95   : > { %1209 = vmatpush1.bf16.msra.mxu0 %v3831_v17  ;;  %3735 = vmatpush1.bf16.msra.mxu1 %v3831_v17  ;;  %v3929_v17 = vld [vmem:[%s4364_s29 + $0x104] ss:$8 sps:$4 sm:$0xff]  }
  0x96   : > { %1210 = vmatprep.subr.bf16.mxu0 %v4179_v0  ;;  %3720 = vmatprep.subr.bf16.mxu1 %v4179_v0  ;;  %v3904_v0 = vld [vmem:[%s4364_s29 + $0x2b0] ss:$8 sps:$4 sm:$0xff]  }
  0x99   : > { %1211 = vmatpush1.bf16.msra.mxu0 %v3832_v18  ;;  %3736 = vmatpush1.bf16.msra.mxu1 %v3832_v18  ;;  %v3931_v18 = vld [vmem:[%s4364_s29 + $0x304] ss:$8 sps:$4 sm:$0xff]  }
  0x9c   : > { %1213 = vmatmul.mubr.bf16.vlgmr.msra.gmra.mrb[0].mxu0 %v3833_v19  ;;  %1469 = vmatmul.mubr.bf16.vlgmr.msra.gmra.mrb[0].mxu1 %v3836_v20  ;;  %v3933_v19 = vld [vmem:[%s4364_s29 + $0x100] ss:$8 sps:$4 sm:$0xff]  }
  0x9d   : > { %1220 = vmatprep.mubr.bf16.mxu0 %v3839_v21  ;;  %1476 = vmatprep.mubr.bf16.mxu1 %v3841_v22  ;;  %v3934_v20 = vld [vmem:[%s4364_s29 + $0x300] ss:$8 sps:$4 sm:$0xff]   ;;  %v3935_v21 = vld [vmem:[%s4364_s29 + $0x114] ss:$8 sps:$4 sm:$0xff]  }
  0x9e   : > { %v3937_v22 = vld [vmem:[%s4364_s29 + $0x314] ss:$8 sps:$4 sm:$0xff]  }
  0xa4   : > { %1221 = vmatmul.mubr.bf16.gmra.mrb[4].mxu0 %v3843_v23  ;;  %1477 = vmatmul.mubr.bf16.gmra.mrb[4].mxu1 %v3844_v24  ;;  %v3939_v23 = vld [vmem:[%s4364_s29 + $0x110] ss:$8 sps:$4 sm:$0xff]  }
  0xa5   : > { %1228 = vmatprep.mubr.bf16.mxu0 %v3845_v25  ;;  %1484 = vmatprep.mubr.bf16.mxu1 %v3847_v26  ;;  %v3940_v24 = vld [vmem:[%s4364_s29 + $0x310] ss:$8 sps:$4 sm:$0xff]   ;;  %v3941_v25 = vld [vmem:[%s4364_s29 + $0x124] ss:$8 sps:$4 sm:$0xff]  }
  0xa6   : > { %v3943_v26 = vld [vmem:[%s4364_s29 + $0x324] ss:$8 sps:$4 sm:$0xff]  }
  0xac   : > { %1229 = vmatmul.mubr.bf16.gmra.mrb[8].mxu0 %v3849_v27  ;;  %1485 = vmatmul.mubr.bf16.gmra.mrb[8].mxu1 %v3850_v28  ;;  %v3945_v27 = vld [vmem:[%s4364_s29 + $0x120] ss:$8 sps:$4 sm:$0xff]  }
  0xad   : > { %1236 = vmatprep.mubr.bf16.mxu0 %v3851_v29  ;;  %1492 = vmatprep.mubr.bf16.mxu1 %v3853_v30  ;;  %v3946_v28 = vld [vmem:[%s4364_s29 + $0x320] ss:$8 sps:$4 sm:$0xff]   ;;  %v3947_v29 = vld [vmem:[%s4364_s29 + $0x134] ss:$8 sps:$4 sm:$0xff]  }
  0xae   : > { %v3949_v30 = vld [vmem:[%s4364_s29 + $0x334] ss:$8 sps:$4 sm:$0xff]  }
  0xb4   : > { %1237 = vmatmul.mubr.bf16.gmra.mrb[12].mxu0 %v3855_v31  ;;  %1493 = vmatmul.mubr.bf16.gmra.mrb[12].mxu1 %v3856_v32  ;;  %v3951_v31 = vld [vmem:[%s4364_s29 + $0x130] ss:$8 sps:$4 sm:$0xff]  }
  0xb5   : > { %1244 = vmatprep.mubr.bf16.mxu0 %v3857_v33  ;;  %1500 = vmatprep.mubr.bf16.mxu1 %v3859_v34  ;;  %v3952_v32 = vld [vmem:[%s4364_s29 + $0x330] ss:$8 sps:$4 sm:$0xff]   ;;  %v3953_v33 = vld [vmem:[%s4364_s29 + $0x144] ss:$8 sps:$4 sm:$0xff]  }
  0xb6   : > { %v3955_v34 = vld [vmem:[%s4364_s29 + $0x344] ss:$8 sps:$4 sm:$0xff]  }
  0xbc   : > { %1245 = vmatmul.mubr.bf16.gmra.mrb[16].mxu0 %v3861_v35  ;;  %1501 = vmatmul.mubr.bf16.gmra.mrb[16].mxu1 %v3862_v36  ;;  %v3957_v35 = vld [vmem:[%s4364_s29 + $0x140] ss:$8 sps:$4 sm:$0xff]  }
  0xbd   : > { %1252 = vmatprep.mubr.bf16.mxu0 %v3863_v37  ;;  %1508 = vmatprep.mubr.bf16.mxu1 %v3865_v38  ;;  %v3958_v36 = vld [vmem:[%s4364_s29 + $0x340] ss:$8 sps:$4 sm:$0xff]   ;;  %v3959_v37 = vld [vmem:[%s4364_s29 + $0x154] ss:$8 sps:$4 sm:$0xff]  }
  0xbe   : > { %v3961_v38 = vld [vmem:[%s4364_s29 + $0x354] ss:$8 sps:$4 sm:$0xff]  }
  0xc4   : > { %1253 = vmatmul.mubr.bf16.gmra.mrb[20].mxu0 %v3867_v39  ;;  %1509 = vmatmul.mubr.bf16.gmra.mrb[20].mxu1 %v3868_v40  ;;  %v3963_v39 = vld [vmem:[%s4364_s29 + $0x150] ss:$8 sps:$4 sm:$0xff]  }
  0xc5   : > { %1260 = vmatprep.mubr.bf16.mxu0 %v3869_v41  ;;  %1516 = vmatprep.mubr.bf16.mxu1 %v3871_v42  ;;  %v3964_v40 = vld [vmem:[%s4364_s29 + $0x350] ss:$8 sps:$4 sm:$0xff]   ;;  %v3965_v41 = vld [vmem:[%s4364_s29 + $0x164] ss:$8 sps:$4 sm:$0xff]  }
  0xc6   : > { %v3967_v42 = vld [vmem:[%s4364_s29 + $0x364] ss:$8 sps:$4 sm:$0xff]  }
  0xcc   : > { %1261 = vmatmul.mubr.bf16.gmra.mrb[24].mxu0 %v3873_v43  ;;  %1517 = vmatmul.mubr.bf16.gmra.mrb[24].mxu1 %v3874_v44  ;;  %v3969_v43 = vld [vmem:[%s4364_s29 + $0x160] ss:$8 sps:$4 sm:$0xff]  }
  0xcd   : > { %1268 = vmatprep.mubr.bf16.mxu0 %v3875_v45  ;;  %1524 = vmatprep.mubr.bf16.mxu1 %v3877_v46  ;;  %v3970_v44 = vld [vmem:[%s4364_s29 + $0x360] ss:$8 sps:$4 sm:$0xff]   ;;  %v3971_v45 = vld [vmem:[%s4364_s29 + $0x174] ss:$8 sps:$4 sm:$0xff]  }
  0xce   : > { %v3973_v46 = vld [vmem:[%s4364_s29 + $0x374] ss:$8 sps:$4 sm:$0xff]  }
  0xd4   : > { %1269 = vmatmul.mubr.bf16.gmra.mrb[28].mxu0 %v3879_v47  ;;  %1525 = vmatmul.mubr.bf16.gmra.mrb[28].mxu1 %v3880_v48  ;;  %v3975_v47 = vld [vmem:[%s4364_s29 + $0x170] ss:$8 sps:$4 sm:$0xff]  }
  0xd5   : > { %1276 = vmatprep.mubr.bf16.mxu0 %v3881_v49  ;;  %1532 = vmatprep.mubr.bf16.mxu1 %v3883_v50  ;;  %v3976_v48 = vld [vmem:[%s4364_s29 + $0x370] ss:$8 sps:$4 sm:$0xff]   ;;  %v3977_v49 = vld [vmem:[%s4364_s29 + $0x184] ss:$8 sps:$4 sm:$0xff]  }
  0xd6   : > { %v3979_v50 = vld [vmem:[%s4364_s29 + $0x384] ss:$8 sps:$4 sm:$0xff]  }
  0xdc   : > { %1277 = vmatmul.mubr.bf16.gmra.mrb[32].mxu0 %v3885_v51  ;;  %1533 = vmatmul.mubr.bf16.gmra.mrb[32].mxu1 %v3886_v52  ;;  %v3981_v51 = vld [vmem:[%s4364_s29 + $0x180] ss:$8 sps:$4 sm:$0xff]  }
  0xdd   : > { %1284 = vmatprep.mubr.bf16.mxu0 %v3887_v53  ;;  %1540 = vmatprep.mubr.bf16.mxu1 %v3889_v54  ;;  %v3982_v52 = vld [vmem:[%s4364_s29 + $0x380] ss:$8 sps:$4 sm:$0xff]   ;;  %v3983_v53 = vld [vmem:[%s4364_s29 + $0x194] ss:$8 sps:$4 sm:$0xff]  }
  0xde   : > { %v3985_v54 = vld [vmem:[%s4364_s29 + $0x394] ss:$8 sps:$4 sm:$0xff]  }
  0xe4   : > { %1285 = vmatmul.mubr.bf16.gmra.mrb[36].mxu0 %v3891_v55  ;;  %1541 = vmatmul.mubr.bf16.gmra.mrb[36].mxu1 %v3892_v56  ;;  %v3987_v55 = vld [vmem:[%s4364_s29 + $0x190] ss:$8 sps:$4 sm:$0xff]  }
  0xe5   : > { %1292 = vmatprep.mubr.bf16.mxu0 %v3893_v57  ;;  %1548 = vmatprep.mubr.bf16.mxu1 %v3895_v58  ;;  %v3988_v56 = vld [vmem:[%s4364_s29 + $0x390] ss:$8 sps:$4 sm:$0xff]   ;;  %v3989_v57 = vld [vmem:[%s4364_s29 + $0x1a4] ss:$8 sps:$4 sm:$0xff]  }
  0xe6   : > { %v3991_v58 = vld [vmem:[%s4364_s29 + $0x3a4] ss:$8 sps:$4 sm:$0xff]  }
  0xec   : > { %1293 = vmatmul.mubr.bf16.gmra.mrb[40].mxu0 %v3897_v59  ;;  %1549 = vmatmul.mubr.bf16.gmra.mrb[40].mxu1 %v3898_v60  ;;  %v3993_v59 = vld [vmem:[%s4364_s29 + $0x1a0] ss:$8 sps:$4 sm:$0xff]  }
  0xed   : > { %1300 = vmatprep.mubr.bf16.mxu0 %v3899_v61  ;;  %1556 = vmatprep.mubr.bf16.mxu1 %v3901_v62  ;;  %v3994_v60 = vld [vmem:[%s4364_s29 + $0x3a0] ss:$8 sps:$4 sm:$0xff]   ;;  %v3995_v61 = vld [vmem:[%s4364_s29 + $0x1b4] ss:$8 sps:$4 sm:$0xff]  }
  0xee   : > { %v3997_v62 = vld [vmem:[%s4364_s29 + $0x3b4] ss:$8 sps:$4 sm:$0xff]  }
  0xf4   : > { %1301 = vmatmul.mubr.bf16.gmra.mrb[44].mxu0 %v3903_v63  ;;  %1557 = vmatmul.mubr.bf16.gmra.mrb[44].mxu1 %v3904_v0  ;;  %v4519_v63 = vld [vmem:[%s4935_s2] ss:$0 sm:$0xff] }
  0xf5   : > { %1308 = vmatprep.mubr.bf16.mxu0 %v3905_v1  ;;  %1564 = vmatprep.mubr.bf16.mxu1 %v3907_v2  ;;  %v4524_v1 = vld [vmem:[%s4936_s3] ss:$0 sm:$0xff] }
  0xfc   : > { %1309 = vmatmul.mubr.bf16.gmra.mrb[48].mxu0 %v3909_v3  ;;  %1565 = vmatmul.mubr.bf16.gmra.mrb[48].mxu1 %v3910_v4 }
  0xfd   : > { %1316 = vmatprep.mubr.bf16.mxu0 %v3911_v5  ;;  %1572 = vmatprep.mubr.bf16.mxu1 %v3913_v6 }
 0x104   : > { %1317 = vmatmul.mubr.bf16.gmra.mrb[52].mxu0 %v3915_v7  ;;  %1573 = vmatmul.mubr.bf16.gmra.mrb[52].mxu1 %v3916_v8  ;;  %v3999_v7 = vld [vmem:[%s4364_s29 + $0x1b0] ss:$8 sps:$4 sm:$0xff]  }
 0x105   : > { %1324 = vmatprep.mubr.bf16.mxu0 %v3917_v9  ;;  %1580 = vmatprep.mubr.bf16.mxu1 %v3919_v10  ;;  %v4000_v8 = vld [vmem:[%s4364_s29 + $0x3b0] ss:$8 sps:$4 sm:$0xff]  }
 0x10c   : > { %1325 = vmatmul.mubr.bf16.gmra.mrb[56].mxu0 %v3921_v11  ;;  %1581 = vmatmul.mubr.bf16.gmra.mrb[56].mxu1 %v3922_v12  ;;  %v4001_v11 = vld [vmem:[%s4364_s29 + $0x1c4] ss:$8 sps:$4 sm:$0xff]  }
 0x10d   : > { %1332 = vmatprep.mubr.bf16.mxu0 %v3923_v13  ;;  %1588 = vmatprep.mubr.bf16.mxu1 %v3925_v14  ;;  %v4003_v12 = vld [vmem:[%s4364_s29 + $0x3c4] ss:$8 sps:$4 sm:$0xff]  }
 0x114   : > { %1333 = vmatmul.mubr.bf16.gmra.mrb[60].mxu0 %v3927_v15  ;;  %1589 = vmatmul.mubr.bf16.gmra.mrb[60].mxu1 %v3928_v16 }
 0x115   : > { %1340 = vmatprep.mubr.bf16.mxu0 %v3929_v17  ;;  %1596 = vmatprep.mubr.bf16.mxu1 %v3931_v18 }
 0x11c   : > { %1341 = vmatmul.mubr.bf16.gmra.mrb[64].mxu0 %v3933_v19  ;;  %1597 = vmatmul.mubr.bf16.gmra.mrb[64].mxu1 %v3934_v20 }
 0x11d   : > { %1348 = vmatprep.mubr.bf16.mxu0 %v3935_v21  ;;  %1604 = vmatprep.mubr.bf16.mxu1 %v3937_v22 }
 0x124   : > { %1349 = vmatmul.mubr.bf16.gmra.mrb[68].mxu0 %v3939_v23  ;;  %1605 = vmatmul.mubr.bf16.gmra.mrb[68].mxu1 %v3940_v24 }
 0x125   : > { %1356 = vmatprep.mubr.bf16.mxu0 %v3941_v25  ;;  %1612 = vmatprep.mubr.bf16.mxu1 %v3943_v26 }
 0x12c   : > { %1357 = vmatmul.mubr.bf16.gmra.mrb[72].mxu0 %v3945_v27  ;;  %1613 = vmatmul.mubr.bf16.gmra.mrb[72].mxu1 %v3946_v28 }
 0x12d   : > { %1364 = vmatprep.mubr.bf16.mxu0 %v3947_v29  ;;  %1620 = vmatprep.mubr.bf16.mxu1 %v3949_v30 }
 0x134   : > { %1365 = vmatmul.mubr.bf16.gmra.mrb[76].mxu0 %v3951_v31  ;;  %1621 = vmatmul.mubr.bf16.gmra.mrb[76].mxu1 %v3952_v32 }
 0x135   : > { %1372 = vmatprep.mubr.bf16.mxu0 %v3953_v33  ;;  %1628 = vmatprep.mubr.bf16.mxu1 %v3955_v34  ;;  %v4005_v33 = vld [vmem:[%s4364_s29 + $0x1c0] ss:$8 sps:$4 sm:$0xff]  }
 0x136   : > { %v4006_v34 = vld [vmem:[%s4364_s29 + $0x3c0] ss:$8 sps:$4 sm:$0xff]  }
 0x13c   : > { %1373 = vmatmul.mubr.bf16.gmra.mrb[80].mxu0 %v3957_v35  ;;  %1629 = vmatmul.mubr.bf16.gmra.mrb[80].mxu1 %v3958_v36 }
 0x13d   : > { %1380 = vmatprep.mubr.bf16.mxu0 %v3959_v37  ;;  %1636 = vmatprep.mubr.bf16.mxu1 %v3961_v38  ;;  %v4007_v37 = vld [vmem:[%s4364_s29 + $0x1d4] ss:$8 sps:$4 sm:$0xff]  }
 0x13e   : > { %v4009_v38 = vld [vmem:[%s4364_s29 + $0x3d4] ss:$8 sps:$4 sm:$0xff]  }
 0x144   : > { %1381 = vmatmul.mubr.bf16.gmra.mrb[84].mxu0 %v3963_v39  ;;  %1637 = vmatmul.mubr.bf16.gmra.mrb[84].mxu1 %v3964_v40 }
 0x145   : > { %1388 = vmatprep.mubr.bf16.mxu0 %v3965_v41  ;;  %1644 = vmatprep.mubr.bf16.mxu1 %v3967_v42 }
 0x14c   : > { %1389 = vmatmul.mubr.bf16.gmra.mrb[88].mxu0 %v3969_v43  ;;  %1645 = vmatmul.mubr.bf16.gmra.mrb[88].mxu1 %v3970_v44 }
 0x14d   : > { %1396 = vmatprep.mubr.bf16.mxu0 %v3971_v45  ;;  %1652 = vmatprep.mubr.bf16.mxu1 %v3973_v46 }
 0x154   : > { %1397 = vmatmul.mubr.bf16.gmra.mrb[92].mxu0 %v3975_v47  ;;  %1653 = vmatmul.mubr.bf16.gmra.mrb[92].mxu1 %v3976_v48 }
 0x155   : > { %1404 = vmatprep.mubr.bf16.mxu0 %v3977_v49  ;;  %1660 = vmatprep.mubr.bf16.mxu1 %v3979_v50 }
 0x15c   : > { %1405 = vmatmul.mubr.bf16.gmra.mrb[96].mxu0 %v3981_v51  ;;  %1661 = vmatmul.mubr.bf16.gmra.mrb[96].mxu1 %v3982_v52 }
 0x15d   : > { %1412 = vmatprep.mubr.bf16.mxu0 %v3983_v53  ;;  %1668 = vmatprep.mubr.bf16.mxu1 %v3985_v54 }
 0x164   : > { %1413 = vmatmul.mubr.bf16.gmra.mrb[100].mxu0 %v3987_v55  ;;  %1669 = vmatmul.mubr.bf16.gmra.mrb[100].mxu1 %v3988_v56 }
 0x165   : > { %1420 = vmatprep.mubr.bf16.mxu0 %v3989_v57  ;;  %1676 = vmatprep.mubr.bf16.mxu1 %v3991_v58 }
 0x16c   : > { %1421 = vmatmul.mubr.bf16.gmra.mrb[104].mxu0 %v3993_v59  ;;  %1677 = vmatmul.mubr.bf16.gmra.mrb[104].mxu1 %v3994_v60  ;;  %v4011_v59 = vld [vmem:[%s4364_s29 + $0x1d0] ss:$8 sps:$4 sm:$0xff]  }
 0x16d   : > { %1428 = vmatprep.mubr.bf16.mxu0 %v3995_v61  ;;  %1684 = vmatprep.mubr.bf16.mxu1 %v3997_v62  ;;  %v4012_v60 = vld [vmem:[%s4364_s29 + $0x3d0] ss:$8 sps:$4 sm:$0xff]  }
 0x16f   : > { %v1214_v0 = vpop.f32.mrb[0].mxu0  ;;  %v1470_v2 = vpop.f32.mrb[0].mxu1 }
 0x170   : > { %v1732_v3 = vmul.f32 %v4519_v63, %v1214_v0  ;;  %v1796_v4 = vmul.f32 %v4519_v63, %v1470_v2  ;;  %v1216_v5 = vpop.f32.mrb[1].mxu0  ;;  %v1472_v6 = vpop.f32.mrb[1].mxu1  ;;  %v4013_v0 = vld [vmem:[%s4364_s29 + $0x1e4] ss:$8 sps:$4 sm:$0xff]  }
 0x171   : > { %v1217_v9 = vpop.f32.mrb[2].mxu0  ;;  %v1473_v10 = vpop.f32.mrb[2].mxu1  ;;  %v4015_v2 = vld [vmem:[%s4364_s29 + $0x3e4] ss:$8 sps:$4 sm:$0xff]  }
 0x172   : > { %v1867_v13 = vadd.f32 %v4524_v1, %v1732_v3  ;;  %v1931_v14 = vadd.f32 %v4524_v1, %v1796_v4  ;;  %v1733_v15 = vmul.f32 %v4519_v63, %v1217_v9  ;;  %v1797_v16 = vmul.f32 %v4519_v63, %v1473_v10  ;;  %v1219_v17 = vpop.f32.mrb[3].mxu0  ;;  %v1475_v18 = vpop.f32.mrb[3].mxu1 }
 0x174   : > { %v1868_v19 = vadd.f32 %v4524_v1, %v1733_v15  ;;  %v1932_v20 = vadd.f32 %v4524_v1, %v1797_v16  ;;  %1429 = vmatmul.mubr.bf16.gmra.mrb[108].mxu0 %v3999_v7  ;;  %1685 = vmatmul.mubr.bf16.gmra.mrb[108].mxu1 %v4000_v8  ;;  %v1995_v21 = vmax.f32 %v1867_v13, 0.0  ;;  %v2059_v22 = vmax.f32 %v1931_v14, 0.0 }
 0x175   : > { %1436 = vmatprep.mubr.bf16.mxu0 %v4001_v11  ;;  %1692 = vmatprep.mubr.bf16.mxu1 %v4003_v12 }
 0x176   : > { %v1996_v23 = vmax.f32 %v1868_v19, 0.0  ;;  %v2060_v24 = vmax.f32 %v1932_v20, 0.0 }
 0x177   : > { %v1222_v25 = vpop.f32.mrb[4].mxu0  ;;  %v1478_v26 = vpop.f32.mrb[4].mxu1 }
 0x178   : > { %v3325_v27 = vpack.c.bf16 %v1996_v23, %v1995_v21  ;;  %v3485_v28 = vpack.c.bf16 %v2060_v24, %v2059_v22  ;;  %v1734_v29 = vmul.f32 %v4519_v63, %v1222_v25  ;;  %v1798_v30 = vmul.f32 %v4519_v63, %v1478_v26  ;;  %v1224_v31 = vpop.f32.mrb[5].mxu0  ;;  %v1480_v32 = vpop.f32.mrb[5].mxu1  ;;  %v4017_v23 = vld [vmem:[%s4364_s29 + $0x1e0] ss:$8 sps:$4 sm:$0xff]  }
 0x179   : > { %v1225_v35 = vpop.f32.mrb[6].mxu0  ;;  %v1481_v36 = vpop.f32.mrb[6].mxu1  ;;  %v4018_v24 = vld [vmem:[%s4364_s29 + $0x3e0] ss:$8 sps:$4 sm:$0xff]  }
 0x17a   : > { %3326 = vst [vmem:[%s4545_s22] sm:$0xff] %v3325_v27   ;;  %3673 = vst [vmem:[%s4545_s22 + $0x100] sm:$0xff] %v3485_v28   ;;  %v1869_v39 = vadd.f32 %v4524_v1, %v1734_v29  ;;  %v1933_v40 = vadd.f32 %v4524_v1, %v1798_v30  ;;  %v1735_v41 = vmul.f32 %v4519_v63, %v1225_v35  ;;  %v1227_v43 = vpop.f32.mrb[7].mxu0  ;;  %v1483_v44 = vpop.f32.mrb[7].mxu1  ;;  %v4019_v27 = vld [vmem:[%s4364_s29 + $0x1f4] ss:$8 sps:$4 sm:$0xff]  }
 0x17b   : > { %v1799_v42 = vmul.f32 %v4519_v63, %v1481_v36  ;;  %v4021_v28 = vld [vmem:[%s4364_s29 + $0x3f4] ss:$8 sps:$4 sm:$0xff]  }
 0x17c   : > { %v1870_v45 = vadd.f32 %v4524_v1, %v1735_v41  ;;  %1437 = vmatmul.mubr.bf16.gmra.mrb[112].mxu0 %v4005_v33  ;;  %1693 = vmatmul.mubr.bf16.gmra.mrb[112].mxu1 %v4006_v34  ;;  %v1997_v47 = vmax.f32 %v1869_v39, 0.0  ;;  %v2061_v48 = vmax.f32 %v1933_v40, 0.0 }
 0x17d   : > { %v1934_v46 = vadd.f32 %v4524_v1, %v1799_v42  ;;  %1444 = vmatprep.mubr.bf16.mxu0 %v4007_v37  ;;  %1700 = vmatprep.mubr.bf16.mxu1 %v4009_v38 }
 0x17e   : > { %v1998_v49 = vmax.f32 %v1870_v45, 0.0 }
 0x17f   : > { %v2062_v50 = vmax.f32 %v1934_v46, 0.0  ;;  %v1230_v51 = vpop.f32.mrb[8].mxu0  ;;  %v1486_v52 = vpop.f32.mrb[8].mxu1 }
 0x180   : > { %v3330_v53 = vpack.c.bf16 %v1998_v49, %v1997_v47  ;;  %v1736_v55 = vmul.f32 %v4519_v63, %v1230_v51  ;;  %v1800_v56 = vmul.f32 %v4519_v63, %v1486_v52  ;;  %v1232_v57 = vpop.f32.mrb[9].mxu0  ;;  %v1488_v58 = vpop.f32.mrb[9].mxu1  ;;  %v4023_v49 = vld [vmem:[%s4364_s29 + $0x1f0] ss:$8 sps:$4 sm:$0xff]  }
 0x181   : > { %v3490_v54 = vpack.c.bf16 %v2062_v50, %v2061_v48  ;;  %v1233_v61 = vpop.f32.mrb[10].mxu0  ;;  %v1489_v62 = vpop.f32.mrb[10].mxu1  ;;  %v4024_v50 = vld [vmem:[%s4364_s29 + $0x3f0] ss:$8 sps:$4 sm:$0xff]   ;;  %s4880_s29 = scalar_lea.hbm %s4937_s4, %s3321_s6 }
 0x182   : > { %3642 = vst [vmem:[%s4545_s22 + $0x8] sm:$0xff] %v3330_v53   ;;  %v1871_v3 = vadd.f32 %v4524_v1, %v1736_v55  ;;  %v1935_v4 = vadd.f32 %v4524_v1, %v1800_v56  ;;  %v1737_v5 = vmul.f32 %v4519_v63, %v1233_v61  ;;  %v1801_v6 = vmul.f32 %v4519_v63, %v1489_v62  ;;  %v1235_v7 = vpop.f32.mrb[11].mxu0  ;;  %v1491_v8 = vpop.f32.mrb[11].mxu1 }
 0x183   : > { %3674 = vst [vmem:[%s4545_s22 + $0x108] sm:$0xff] %v3490_v54  }
 0x184   : > { %v1872_v9 = vadd.f32 %v4524_v1, %v1737_v5  ;;  %v1936_v10 = vadd.f32 %v4524_v1, %v1801_v6  ;;  %1445 = vmatmul.mubr.bf16.gmra.mrb[116].mxu0 %v4011_v59  ;;  %1701 = vmatmul.mubr.bf16.gmra.mrb[116].mxu1 %v4012_v60  ;;  %v1999_v11 = vmax.f32 %v1871_v3, 0.0  ;;  %v2063_v12 = vmax.f32 %v1935_v4, 0.0 }
 0x185   : > { %1452 = vmatprep.mubr.bf16.mxu0 %v4013_v0  ;;  %1708 = vmatprep.mubr.bf16.mxu1 %v4015_v2 }
 0x186   : > { %v2000_v13 = vmax.f32 %v1872_v9, 0.0  ;;  %v2064_v14 = vmax.f32 %v1936_v10, 0.0 }
 0x187   : > { %v1238_v15 = vpop.f32.mrb[12].mxu0  ;;  %v1494_v16 = vpop.f32.mrb[12].mxu1 }
 0x188   : > { %v3335_v17 = vpack.c.bf16 %v2000_v13, %v1999_v11  ;;  %v3495_v18 = vpack.c.bf16 %v2064_v14, %v2063_v12  ;;  %v1738_v19 = vmul.f32 %v4519_v63, %v1238_v15  ;;  %v1802_v20 = vmul.f32 %v4519_v63, %v1494_v16  ;;  %v1240_v21 = vpop.f32.mrb[13].mxu0  ;;  %v1496_v22 = vpop.f32.mrb[13].mxu1 }
 0x189   : > { %v1241_v25 = vpop.f32.mrb[14].mxu0  ;;  %v1497_v26 = vpop.f32.mrb[14].mxu1 }
 0x18a   : > { %3643 = vst [vmem:[%s4545_s22 + $0x10] sm:$0xff] %v3335_v17   ;;  %3675 = vst [vmem:[%s4545_s22 + $0x110] sm:$0xff] %v3495_v18   ;;  %v1873_v29 = vadd.f32 %v4524_v1, %v1738_v19  ;;  %v1937_v30 = vadd.f32 %v4524_v1, %v1802_v20  ;;  %v1739_v31 = vmul.f32 %v4519_v63, %v1241_v25  ;;  %v1243_v33 = vpop.f32.mrb[15].mxu0  ;;  %v1499_v34 = vpop.f32.mrb[15].mxu1 }
 0x18b   : > { %v1803_v32 = vmul.f32 %v4519_v63, %v1497_v26 }
 0x18c   : > { %v1874_v35 = vadd.f32 %v4524_v1, %v1739_v31  ;;  %1453 = vmatmul.mubr.bf16.gmra.mrb[120].mxu0 %v4017_v23  ;;  %1709 = vmatmul.mubr.bf16.gmra.mrb[120].mxu1 %v4018_v24  ;;  %v2001_v37 = vmax.f32 %v1873_v29, 0.0  ;;  %v2065_v38 = vmax.f32 %v1937_v30, 0.0 }
 0x18d   : > { %v1938_v36 = vadd.f32 %v4524_v1, %v1803_v32  ;;  %1460 = vmatprep.mubr.bf16.mxu0 %v4019_v27  ;;  %1716 = vmatprep.mubr.bf16.mxu1 %v4021_v28 }
 0x18e   : > { %v2002_v39 = vmax.f32 %v1874_v35, 0.0 }
 0x18f   : > { %v2066_v40 = vmax.f32 %v1938_v36, 0.0  ;;  %v1246_v41 = vpop.f32.mrb[16].mxu0  ;;  %v1502_v42 = vpop.f32.mrb[16].mxu1 }
 0x190   : > { %v3340_v43 = vpack.c.bf16 %v2002_v39, %v2001_v37  ;;  %v1740_v45 = vmul.f32 %v4519_v63, %v1246_v41  ;;  %v1804_v46 = vmul.f32 %v4519_v63, %v1502_v42  ;;  %v1248_v47 = vpop.f32.mrb[17].mxu0  ;;  %v1504_v48 = vpop.f32.mrb[17].mxu1 }
 0x191   : > { %v3500_v44 = vpack.c.bf16 %v2066_v40, %v2065_v38  ;;  %v1249_v51 = vpop.f32.mrb[18].mxu0  ;;  %v1505_v52 = vpop.f32.mrb[18].mxu1 }
 0x192   : > { %3644 = vst [vmem:[%s4545_s22 + $0x18] sm:$0xff] %v3340_v43   ;;  %v1875_v53 = vadd.f32 %v4524_v1, %v1740_v45  ;;  %v1939_v54 = vadd.f32 %v4524_v1, %v1804_v46  ;;  %v1741_v55 = vmul.f32 %v4519_v63, %v1249_v51  ;;  %v1805_v56 = vmul.f32 %v4519_v63, %v1505_v52  ;;  %v1251_v57 = vpop.f32.mrb[19].mxu0  ;;  %v1507_v58 = vpop.f32.mrb[19].mxu1 }
 0x193   : > { %3676 = vst [vmem:[%s4545_s22 + $0x118] sm:$0xff] %v3500_v44  }
 0x194   : > { %v1876_v59 = vadd.f32 %v4524_v1, %v1741_v55  ;;  %v1940_v60 = vadd.f32 %v4524_v1, %v1805_v56  ;;  %1461 = vmatmul.mubr.bf16.gmra.mrb[124].mxu0 %v4023_v49  ;;  %1717 = vmatmul.mubr.bf16.gmra.mrb[124].mxu1 %v4024_v50  ;;  %v2003_v61 = vmax.f32 %v1875_v53, 0.0  ;;  %v2067_v62 = vmax.f32 %v1939_v54, 0.0 }
 0x196   : > { %v2004_v0 = vmax.f32 %v1876_v59, 0.0  ;;  %v2068_v2 = vmax.f32 %v1940_v60, 0.0 }
 0x197   : > { %v1254_v3 = vpop.f32.mrb[20].mxu0  ;;  %v1510_v4 = vpop.f32.mrb[20].mxu1 }
 0x198   : > { %v3345_v5 = vpack.c.bf16 %v2004_v0, %v2003_v61  ;;  %v3505_v6 = vpack.c.bf16 %v2068_v2, %v2067_v62  ;;  %v1742_v7 = vmul.f32 %v4519_v63, %v1254_v3  ;;  %v1806_v8 = vmul.f32 %v4519_v63, %v1510_v4  ;;  %v1256_v9 = vpop.f32.mrb[21].mxu0  ;;  %v1512_v10 = vpop.f32.mrb[21].mxu1 }
 0x199   : > { %v1257_v11 = vpop.f32.mrb[22].mxu0  ;;  %v1513_v12 = vpop.f32.mrb[22].mxu1 }
 0x19a   : > { %3645 = vst [vmem:[%s4545_s22 + $0x20] sm:$0xff] %v3345_v5   ;;  %3677 = vst [vmem:[%s4545_s22 + $0x120] sm:$0xff] %v3505_v6   ;;  %v1877_v13 = vadd.f32 %v4524_v1, %v1742_v7  ;;  %v1941_v14 = vadd.f32 %v4524_v1, %v1806_v8  ;;  %v1743_v15 = vmul.f32 %v4519_v63, %v1257_v11  ;;  %v1259_v17 = vpop.f32.mrb[23].mxu0  ;;  %v1515_v18 = vpop.f32.mrb[23].mxu1 }
 0x19b   : > { %v1807_v16 = vmul.f32 %v4519_v63, %v1513_v12 }
 0x19c   : > { %v1878_v19 = vadd.f32 %v4524_v1, %v1743_v15  ;;  %v2005_v21 = vmax.f32 %v1877_v13, 0.0  ;;  %v2069_v22 = vmax.f32 %v1941_v14, 0.0 }
 0x19d   : > { %v1942_v20 = vadd.f32 %v4524_v1, %v1807_v16 }
 0x19e   : > { %v2006_v23 = vmax.f32 %v1878_v19, 0.0 }
 0x19f   : > { %v2070_v24 = vmax.f32 %v1942_v20, 0.0  ;;  %v1262_v25 = vpop.f32.mrb[24].mxu0  ;;  %v1518_v26 = vpop.f32.mrb[24].mxu1 }
 0x1a0   : > { %v3350_v27 = vpack.c.bf16 %v2006_v23, %v2005_v21  ;;  %v1744_v29 = vmul.f32 %v4519_v63, %v1262_v25  ;;  %v1808_v30 = vmul.f32 %v4519_v63, %v1518_v26  ;;  %v1264_v31 = vpop.f32.mrb[25].mxu0  ;;  %v1520_v32 = vpop.f32.mrb[25].mxu1 }
 0x1a1   : > { %v3510_v28 = vpack.c.bf16 %v2070_v24, %v2069_v22  ;;  %v1265_v33 = vpop.f32.mrb[26].mxu0  ;;  %v1521_v34 = vpop.f32.mrb[26].mxu1 }
 0x1a2   : > { %3646 = vst [vmem:[%s4545_s22 + $0x28] sm:$0xff] %v3350_v27   ;;  %v1879_v35 = vadd.f32 %v4524_v1, %v1744_v29  ;;  %v1943_v36 = vadd.f32 %v4524_v1, %v1808_v30  ;;  %v1745_v37 = vmul.f32 %v4519_v63, %v1265_v33  ;;  %v1809_v38 = vmul.f32 %v4519_v63, %v1521_v34  ;;  %v1267_v39 = vpop.f32.mrb[27].mxu0  ;;  %v1523_v40 = vpop.f32.mrb[27].mxu1 }
 0x1a3   : > { %3678 = vst [vmem:[%s4545_s22 + $0x128] sm:$0xff] %v3510_v28  }
 0x1a4   : > { %v1880_v41 = vadd.f32 %v4524_v1, %v1745_v37  ;;  %v1944_v42 = vadd.f32 %v4524_v1, %v1809_v38  ;;  %v2007_v43 = vmax.f32 %v1879_v35, 0.0  ;;  %v2071_v44 = vmax.f32 %v1943_v36, 0.0 }
 0x1a6   : > { %v2008_v45 = vmax.f32 %v1880_v41, 0.0  ;;  %v2072_v46 = vmax.f32 %v1944_v42, 0.0 }
 0x1a7   : > { %v1270_v47 = vpop.f32.mrb[28].mxu0  ;;  %v1526_v48 = vpop.f32.mrb[28].mxu1 }
 0x1a8   : > { %v3355_v49 = vpack.c.bf16 %v2008_v45, %v2007_v43  ;;  %v3515_v50 = vpack.c.bf16 %v2072_v46, %v2071_v44  ;;  %v1746_v51 = vmul.f32 %v4519_v63, %v1270_v47  ;;  %v1810_v52 = vmul.f32 %v4519_v63, %v1526_v48  ;;  %v1272_v53 = vpop.f32.mrb[29].mxu0  ;;  %v1528_v54 = vpop.f32.mrb[29].mxu1 }
 0x1a9   : > { %v1273_v55 = vpop.f32.mrb[30].mxu0  ;;  %v1529_v56 = vpop.f32.mrb[30].mxu1 }
 0x1aa   : > { %3647 = vst [vmem:[%s4545_s22 + $0x30] sm:$0xff] %v3355_v49   ;;  %3679 = vst [vmem:[%s4545_s22 + $0x130] sm:$0xff] %v3515_v50   ;;  %v1881_v57 = vadd.f32 %v4524_v1, %v1746_v51  ;;  %v1945_v58 = vadd.f32 %v4524_v1, %v1810_v52  ;;  %v1747_v59 = vmul.f32 %v4519_v63, %v1273_v55  ;;  %v1275_v61 = vpop.f32.mrb[31].mxu0  ;;  %v1531_v62 = vpop.f32.mrb[31].mxu1 }
 0x1ab   : > { %v1811_v60 = vmul.f32 %v4519_v63, %v1529_v56 }
 0x1ac   : > { %v1882_v0 = vadd.f32 %v4524_v1, %v1747_v59  ;;  %v2009_v3 = vmax.f32 %v1881_v57, 0.0  ;;  %v2073_v4 = vmax.f32 %v1945_v58, 0.0 }
 0x1ad   : > { %v1946_v2 = vadd.f32 %v4524_v1, %v1811_v60 }
 0x1ae   : > { %v2010_v5 = vmax.f32 %v1882_v0, 0.0 }
 0x1af   : > { %v2074_v6 = vmax.f32 %v1946_v2, 0.0  ;;  %v1278_v7 = vpop.f32.mrb[32].mxu0  ;;  %v1534_v8 = vpop.f32.mrb[32].mxu1 }
 0x1b0   : > { %v3360_v9 = vpack.c.bf16 %v2010_v5, %v2009_v3  ;;  %v1748_v11 = vmul.f32 %v4519_v63, %v1278_v7  ;;  %v1812_v12 = vmul.f32 %v4519_v63, %v1534_v8  ;;  %v1280_v13 = vpop.f32.mrb[33].mxu0  ;;  %v1536_v14 = vpop.f32.mrb[33].mxu1 }
 0x1b1   : > { %v3520_v10 = vpack.c.bf16 %v2074_v6, %v2073_v4  ;;  %v1281_v15 = vpop.f32.mrb[34].mxu0  ;;  %v1537_v16 = vpop.f32.mrb[34].mxu1 }
 0x1b2   : > { %3648 = vst [vmem:[%s4545_s22 + $0x38] sm:$0xff] %v3360_v9   ;;  %v1883_v17 = vadd.f32 %v4524_v1, %v1748_v11  ;;  %v1947_v18 = vadd.f32 %v4524_v1, %v1812_v12  ;;  %v1749_v19 = vmul.f32 %v4519_v63, %v1281_v15  ;;  %v1813_v20 = vmul.f32 %v4519_v63, %v1537_v16  ;;  %v1283_v21 = vpop.f32.mrb[35].mxu0  ;;  %v1539_v22 = vpop.f32.mrb[35].mxu1 }
 0x1b3   : > { %3680 = vst [vmem:[%s4545_s22 + $0x138] sm:$0xff] %v3520_v10  }
 0x1b4   : > { %v1884_v23 = vadd.f32 %v4524_v1, %v1749_v19  ;;  %v1948_v24 = vadd.f32 %v4524_v1, %v1813_v20  ;;  %v2011_v25 = vmax.f32 %v1883_v17, 0.0  ;;  %v2075_v26 = vmax.f32 %v1947_v18, 0.0 }
 0x1b6   : > { %v2012_v27 = vmax.f32 %v1884_v23, 0.0  ;;  %v2076_v28 = vmax.f32 %v1948_v24, 0.0 }
 0x1b7   : > { %v1286_v29 = vpop.f32.mrb[36].mxu0  ;;  %v1542_v30 = vpop.f32.mrb[36].mxu1 }
 0x1b8   : > { %v3365_v31 = vpack.c.bf16 %v2012_v27, %v2011_v25  ;;  %v3525_v32 = vpack.c.bf16 %v2076_v28, %v2075_v26  ;;  %v1750_v33 = vmul.f32 %v4519_v63, %v1286_v29  ;;  %v1814_v34 = vmul.f32 %v4519_v63, %v1542_v30  ;;  %v1288_v35 = vpop.f32.mrb[37].mxu0  ;;  %v1544_v36 = vpop.f32.mrb[37].mxu1 }
 0x1b9   : > { %v1289_v37 = vpop.f32.mrb[38].mxu0  ;;  %v1545_v38 = vpop.f32.mrb[38].mxu1 }
 0x1ba   : > { %3649 = vst [vmem:[%s4545_s22 + $0x40] sm:$0xff] %v3365_v31   ;;  %3681 = vst [vmem:[%s4545_s22 + $0x140] sm:$0xff] %v3525_v32   ;;  %v1885_v39 = vadd.f32 %v4524_v1, %v1750_v33  ;;  %v1949_v40 = vadd.f32 %v4524_v1, %v1814_v34  ;;  %v1751_v41 = vmul.f32 %v4519_v63, %v1289_v37  ;;  %v1291_v43 = vpop.f32.mrb[39].mxu0  ;;  %v1547_v44 = vpop.f32.mrb[39].mxu1 }
 0x1bb   : > { %v1815_v42 = vmul.f32 %v4519_v63, %v1545_v38 }
 0x1bc   : > { %v1886_v45 = vadd.f32 %v4524_v1, %v1751_v41  ;;  %v2013_v47 = vmax.f32 %v1885_v39, 0.0  ;;  %v2077_v48 = vmax.f32 %v1949_v40, 0.0 }
 0x1bd   : > { %v1950_v46 = vadd.f32 %v4524_v1, %v1815_v42 }
 0x1be   : > { %v2014_v49 = vmax.f32 %v1886_v45, 0.0 }
 0x1bf   : > { %v2078_v50 = vmax.f32 %v1950_v46, 0.0  ;;  %v1294_v51 = vpop.f32.mrb[40].mxu0  ;;  %v1550_v52 = vpop.f32.mrb[40].mxu1 }
 0x1c0   : > { %v3370_v53 = vpack.c.bf16 %v2014_v49, %v2013_v47  ;;  %v1752_v55 = vmul.f32 %v4519_v63, %v1294_v51  ;;  %v1816_v56 = vmul.f32 %v4519_v63, %v1550_v52  ;;  %v1296_v57 = vpop.f32.mrb[41].mxu0  ;;  %v1552_v58 = vpop.f32.mrb[41].mxu1 }
 0x1c1   : > { %v3530_v54 = vpack.c.bf16 %v2078_v50, %v2077_v48  ;;  %v1297_v59 = vpop.f32.mrb[42].mxu0  ;;  %v1553_v60 = vpop.f32.mrb[42].mxu1 }
 0x1c2   : > { %3650 = vst [vmem:[%s4545_s22 + $0x48] sm:$0xff] %v3370_v53   ;;  %v1887_v61 = vadd.f32 %v4524_v1, %v1752_v55  ;;  %v1951_v62 = vadd.f32 %v4524_v1, %v1816_v56  ;;  %v1753_v0 = vmul.f32 %v4519_v63, %v1297_v59  ;;  %v1817_v2 = vmul.f32 %v4519_v63, %v1553_v60  ;;  %v1299_v3 = vpop.f32.mrb[43].mxu0  ;;  %v1555_v4 = vpop.f32.mrb[43].mxu1 }
 0x1c3   : > { %3682 = vst [vmem:[%s4545_s22 + $0x148] sm:$0xff] %v3530_v54  }
 0x1c4   : > { %v1888_v5 = vadd.f32 %v4524_v1, %v1753_v0  ;;  %v1952_v6 = vadd.f32 %v4524_v1, %v1817_v2  ;;  %v2015_v7 = vmax.f32 %v1887_v61, 0.0  ;;  %v2079_v8 = vmax.f32 %v1951_v62, 0.0 }
 0x1c6   : > { %v2016_v9 = vmax.f32 %v1888_v5, 0.0  ;;  %v2080_v10 = vmax.f32 %v1952_v6, 0.0 }
 0x1c7   : > { %v1302_v11 = vpop.f32.mrb[44].mxu0  ;;  %v1558_v12 = vpop.f32.mrb[44].mxu1 }
 0x1c8   : > { %v3375_v13 = vpack.c.bf16 %v2016_v9, %v2015_v7  ;;  %v3535_v14 = vpack.c.bf16 %v2080_v10, %v2079_v8  ;;  %v1754_v15 = vmul.f32 %v4519_v63, %v1302_v11  ;;  %v1818_v16 = vmul.f32 %v4519_v63, %v1558_v12  ;;  %v1304_v17 = vpop.f32.mrb[45].mxu0  ;;  %v1560_v18 = vpop.f32.mrb[45].mxu1 }
 0x1c9   : > { %v1305_v19 = vpop.f32.mrb[46].mxu0  ;;  %v1561_v20 = vpop.f32.mrb[46].mxu1 }
 0x1ca   : > { %3651 = vst [vmem:[%s4545_s22 + $0x50] sm:$0xff] %v3375_v13   ;;  %3683 = vst [vmem:[%s4545_s22 + $0x150] sm:$0xff] %v3535_v14   ;;  %v1889_v21 = vadd.f32 %v4524_v1, %v1754_v15  ;;  %v1953_v22 = vadd.f32 %v4524_v1, %v1818_v16  ;;  %v1755_v23 = vmul.f32 %v4519_v63, %v1305_v19  ;;  %v1307_v25 = vpop.f32.mrb[47].mxu0  ;;  %v1563_v26 = vpop.f32.mrb[47].mxu1 }
 0x1cb   : > { %v1819_v24 = vmul.f32 %v4519_v63, %v1561_v20 }
 0x1cc   : > { %v1890_v27 = vadd.f32 %v4524_v1, %v1755_v23  ;;  %v2017_v29 = vmax.f32 %v1889_v21, 0.0  ;;  %v2081_v30 = vmax.f32 %v1953_v22, 0.0 }
 0x1cd   : > { %v1954_v28 = vadd.f32 %v4524_v1, %v1819_v24 }
 0x1ce   : > { %v2018_v31 = vmax.f32 %v1890_v27, 0.0 }
 0x1cf   : > { %v2082_v32 = vmax.f32 %v1954_v28, 0.0  ;;  %v1310_v33 = vpop.f32.mrb[48].mxu0  ;;  %v1566_v34 = vpop.f32.mrb[48].mxu1 }
 0x1d0   : > { %v3380_v35 = vpack.c.bf16 %v2018_v31, %v2017_v29  ;;  %v1756_v37 = vmul.f32 %v4519_v63, %v1310_v33  ;;  %v1820_v38 = vmul.f32 %v4519_v63, %v1566_v34  ;;  %v1312_v39 = vpop.f32.mrb[49].mxu0  ;;  %v1568_v40 = vpop.f32.mrb[49].mxu1 }
 0x1d1   : > { %v3540_v36 = vpack.c.bf16 %v2082_v32, %v2081_v30  ;;  %v1313_v41 = vpop.f32.mrb[50].mxu0  ;;  %v1569_v42 = vpop.f32.mrb[50].mxu1 }
 0x1d2   : > { %3652 = vst [vmem:[%s4545_s22 + $0x58] sm:$0xff] %v3380_v35   ;;  %v1891_v43 = vadd.f32 %v4524_v1, %v1756_v37  ;;  %v1955_v44 = vadd.f32 %v4524_v1, %v1820_v38  ;;  %v1757_v45 = vmul.f32 %v4519_v63, %v1313_v41  ;;  %v1821_v46 = vmul.f32 %v4519_v63, %v1569_v42  ;;  %v1315_v47 = vpop.f32.mrb[51].mxu0  ;;  %v1571_v48 = vpop.f32.mrb[51].mxu1 }
 0x1d3   : > { %3684 = vst [vmem:[%s4545_s22 + $0x158] sm:$0xff] %v3540_v36  }
 0x1d4   : > { %v1892_v49 = vadd.f32 %v4524_v1, %v1757_v45  ;;  %v1956_v50 = vadd.f32 %v4524_v1, %v1821_v46  ;;  %v2019_v51 = vmax.f32 %v1891_v43, 0.0  ;;  %v2083_v52 = vmax.f32 %v1955_v44, 0.0 }
 0x1d6   : > { %v2020_v53 = vmax.f32 %v1892_v49, 0.0  ;;  %v2084_v54 = vmax.f32 %v1956_v50, 0.0 }
 0x1d7   : > { %v1318_v55 = vpop.f32.mrb[52].mxu0  ;;  %v1574_v56 = vpop.f32.mrb[52].mxu1 }
 0x1d8   : > { %v3385_v57 = vpack.c.bf16 %v2020_v53, %v2019_v51  ;;  %v3545_v58 = vpack.c.bf16 %v2084_v54, %v2083_v52  ;;  %v1758_v59 = vmul.f32 %v4519_v63, %v1318_v55  ;;  %v1822_v60 = vmul.f32 %v4519_v63, %v1574_v56  ;;  %v1320_v61 = vpop.f32.mrb[53].mxu0  ;;  %v1576_v62 = vpop.f32.mrb[53].mxu1 }
 0x1d9   : > { %v1321_v0 = vpop.f32.mrb[54].mxu0  ;;  %v1577_v2 = vpop.f32.mrb[54].mxu1 }
 0x1da   : > { %3653 = vst [vmem:[%s4545_s22 + $0x60] sm:$0xff] %v3385_v57   ;;  %3685 = vst [vmem:[%s4545_s22 + $0x160] sm:$0xff] %v3545_v58   ;;  %v1893_v3 = vadd.f32 %v4524_v1, %v1758_v59  ;;  %v1957_v4 = vadd.f32 %v4524_v1, %v1822_v60  ;;  %v1759_v5 = vmul.f32 %v4519_v63, %v1321_v0  ;;  %v1323_v7 = vpop.f32.mrb[55].mxu0  ;;  %v1579_v8 = vpop.f32.mrb[55].mxu1 }
 0x1db   : > { %v1823_v6 = vmul.f32 %v4519_v63, %v1577_v2 }
 0x1dc   : > { %v1894_v9 = vadd.f32 %v4524_v1, %v1759_v5  ;;  %v2021_v11 = vmax.f32 %v1893_v3, 0.0  ;;  %v2085_v12 = vmax.f32 %v1957_v4, 0.0 }
 0x1dd   : > { %v1958_v10 = vadd.f32 %v4524_v1, %v1823_v6 }
 0x1de   : > { %v2022_v13 = vmax.f32 %v1894_v9, 0.0 }
 0x1df   : > { %v2086_v14 = vmax.f32 %v1958_v10, 0.0  ;;  %v1326_v15 = vpop.f32.mrb[56].mxu0  ;;  %v1582_v16 = vpop.f32.mrb[56].mxu1 }
 0x1e0   : > { %v3390_v17 = vpack.c.bf16 %v2022_v13, %v2021_v11  ;;  %v1760_v19 = vmul.f32 %v4519_v63, %v1326_v15  ;;  %v1824_v20 = vmul.f32 %v4519_v63, %v1582_v16  ;;  %v1328_v21 = vpop.f32.mrb[57].mxu0  ;;  %v1584_v22 = vpop.f32.mrb[57].mxu1 }
 0x1e1   : > { %v3550_v18 = vpack.c.bf16 %v2086_v14, %v2085_v12  ;;  %v1329_v23 = vpop.f32.mrb[58].mxu0  ;;  %v1585_v24 = vpop.f32.mrb[58].mxu1 }
 0x1e2   : > { %3654 = vst [vmem:[%s4545_s22 + $0x68] sm:$0xff] %v3390_v17   ;;  %v1895_v25 = vadd.f32 %v4524_v1, %v1760_v19  ;;  %v1959_v26 = vadd.f32 %v4524_v1, %v1824_v20  ;;  %v1761_v27 = vmul.f32 %v4519_v63, %v1329_v23  ;;  %v1825_v28 = vmul.f32 %v4519_v63, %v1585_v24  ;;  %v1331_v29 = vpop.f32.mrb[59].mxu0  ;;  %v1587_v30 = vpop.f32.mrb[59].mxu1 }
 0x1e3   : > { %3686 = vst [vmem:[%s4545_s22 + $0x168] sm:$0xff] %v3550_v18  }
 0x1e4   : > { %v1896_v31 = vadd.f32 %v4524_v1, %v1761_v27  ;;  %v1960_v32 = vadd.f32 %v4524_v1, %v1825_v28  ;;  %v2023_v33 = vmax.f32 %v1895_v25, 0.0  ;;  %v2087_v34 = vmax.f32 %v1959_v26, 0.0 }
 0x1e6   : > { %v2024_v35 = vmax.f32 %v1896_v31, 0.0  ;;  %v2088_v36 = vmax.f32 %v1960_v32, 0.0 }
 0x1e7   : > { %v1334_v37 = vpop.f32.mrb[60].mxu0  ;;  %v1590_v38 = vpop.f32.mrb[60].mxu1 }
 0x1e8   : > { %v3395_v39 = vpack.c.bf16 %v2024_v35, %v2023_v33  ;;  %v3555_v40 = vpack.c.bf16 %v2088_v36, %v2087_v34  ;;  %v1762_v41 = vmul.f32 %v4519_v63, %v1334_v37  ;;  %v1826_v42 = vmul.f32 %v4519_v63, %v1590_v38  ;;  %v1336_v43 = vpop.f32.mrb[61].mxu0  ;;  %v1592_v44 = vpop.f32.mrb[61].mxu1 }
 0x1e9   : > { %v1337_v45 = vpop.f32.mrb[62].mxu0  ;;  %v1593_v46 = vpop.f32.mrb[62].mxu1 }
 0x1ea   : > { %3655 = vst [vmem:[%s4545_s22 + $0x70] sm:$0xff] %v3395_v39   ;;  %3687 = vst [vmem:[%s4545_s22 + $0x170] sm:$0xff] %v3555_v40   ;;  %v1897_v47 = vadd.f32 %v4524_v1, %v1762_v41  ;;  %v1961_v48 = vadd.f32 %v4524_v1, %v1826_v42  ;;  %v1763_v49 = vmul.f32 %v4519_v63, %v1337_v45  ;;  %v1339_v51 = vpop.f32.mrb[63].mxu0  ;;  %v1595_v52 = vpop.f32.mrb[63].mxu1 }
 0x1eb   : > { %v1827_v50 = vmul.f32 %v4519_v63, %v1593_v46 }
 0x1ec   : > { %v1898_v53 = vadd.f32 %v4524_v1, %v1763_v49  ;;  %v2025_v55 = vmax.f32 %v1897_v47, 0.0  ;;  %v2089_v56 = vmax.f32 %v1961_v48, 0.0 }
 0x1ed   : > { %v1962_v54 = vadd.f32 %v4524_v1, %v1827_v50 }
 0x1ee   : > { %v2026_v57 = vmax.f32 %v1898_v53, 0.0 }
 0x1ef   : > { %v2090_v58 = vmax.f32 %v1962_v54, 0.0  ;;  %v1342_v59 = vpop.f32.mrb[64].mxu0  ;;  %v1598_v60 = vpop.f32.mrb[64].mxu1 }
 0x1f0   : > { %v3400_v61 = vpack.c.bf16 %v2026_v57, %v2025_v55  ;;  %v1764_v0 = vmul.f32 %v4519_v63, %v1342_v59  ;;  %v1828_v2 = vmul.f32 %v4519_v63, %v1598_v60  ;;  %v1344_v3 = vpop.f32.mrb[65].mxu0  ;;  %v1600_v4 = vpop.f32.mrb[65].mxu1 }
 0x1f1   : > { %v3560_v62 = vpack.c.bf16 %v2090_v58, %v2089_v56  ;;  %v1345_v5 = vpop.f32.mrb[66].mxu0  ;;  %v1601_v6 = vpop.f32.mrb[66].mxu1 }
 0x1f2   : > { %3656 = vst [vmem:[%s4545_s22 + $0x78] sm:$0xff] %v3400_v61   ;;  %v1899_v7 = vadd.f32 %v4524_v1, %v1764_v0  ;;  %v1963_v8 = vadd.f32 %v4524_v1, %v1828_v2  ;;  %v1765_v9 = vmul.f32 %v4519_v63, %v1345_v5  ;;  %v1829_v10 = vmul.f32 %v4519_v63, %v1601_v6  ;;  %v1347_v11 = vpop.f32.mrb[67].mxu0  ;;  %v1603_v12 = vpop.f32.mrb[67].mxu1 }
 0x1f3   : > { %3688 = vst [vmem:[%s4545_s22 + $0x178] sm:$0xff] %v3560_v62  }
 0x1f4   : > { %v1900_v13 = vadd.f32 %v4524_v1, %v1765_v9  ;;  %v1964_v14 = vadd.f32 %v4524_v1, %v1829_v10  ;;  %v2027_v15 = vmax.f32 %v1899_v7, 0.0  ;;  %v2091_v16 = vmax.f32 %v1963_v8, 0.0 }
 0x1f6   : > { %v2028_v17 = vmax.f32 %v1900_v13, 0.0  ;;  %v2092_v18 = vmax.f32 %v1964_v14, 0.0 }
 0x1f7   : > { %v1350_v19 = vpop.f32.mrb[68].mxu0  ;;  %v1606_v20 = vpop.f32.mrb[68].mxu1 }
 0x1f8   : > { %v3405_v21 = vpack.c.bf16 %v2028_v17, %v2027_v15  ;;  %v3565_v22 = vpack.c.bf16 %v2092_v18, %v2091_v16  ;;  %v1766_v23 = vmul.f32 %v4519_v63, %v1350_v19  ;;  %v1830_v24 = vmul.f32 %v4519_v63, %v1606_v20  ;;  %v1352_v25 = vpop.f32.mrb[69].mxu0  ;;  %v1608_v26 = vpop.f32.mrb[69].mxu1 }
 0x1f9   : > { %v1353_v27 = vpop.f32.mrb[70].mxu0  ;;  %v1609_v28 = vpop.f32.mrb[70].mxu1 }
 0x1fa   : > { %3657 = vst [vmem:[%s4545_s22 + $0x80] sm:$0xff] %v3405_v21   ;;  %3689 = vst [vmem:[%s4545_s22 + $0x180] sm:$0xff] %v3565_v22   ;;  %v1901_v29 = vadd.f32 %v4524_v1, %v1766_v23  ;;  %v1965_v30 = vadd.f32 %v4524_v1, %v1830_v24  ;;  %v1767_v31 = vmul.f32 %v4519_v63, %v1353_v27  ;;  %v1355_v33 = vpop.f32.mrb[71].mxu0  ;;  %v1611_v34 = vpop.f32.mrb[71].mxu1 }
 0x1fb   : > { %v1831_v32 = vmul.f32 %v4519_v63, %v1609_v28 }
 0x1fc   : > { %v1902_v35 = vadd.f32 %v4524_v1, %v1767_v31  ;;  %v2029_v37 = vmax.f32 %v1901_v29, 0.0  ;;  %v2093_v38 = vmax.f32 %v1965_v30, 0.0 }
 0x1fd   : > { %v1966_v36 = vadd.f32 %v4524_v1, %v1831_v32  ;;  %v4757_v32 = vld [vmem:[%s4936_s3] ss:$0 sm:$0xff] }
 0x1fe   : > { %v2030_v39 = vmax.f32 %v1902_v35, 0.0 }
 0x1ff   : > { %v2094_v40 = vmax.f32 %v1966_v36, 0.0  ;;  %v1358_v41 = vpop.f32.mrb[72].mxu0  ;;  %v1614_v42 = vpop.f32.mrb[72].mxu1 }
 0x200   : > { %v3410_v43 = vpack.c.bf16 %v2030_v39, %v2029_v37  ;;  %v1768_v45 = vmul.f32 %v4519_v63, %v1358_v41  ;;  %v1832_v46 = vmul.f32 %v4519_v63, %v1614_v42  ;;  %v1360_v47 = vpop.f32.mrb[73].mxu0  ;;  %v1616_v48 = vpop.f32.mrb[73].mxu1 }
 0x201   : > { %v3570_v44 = vpack.c.bf16 %v2094_v40, %v2093_v38  ;;  %v1361_v49 = vpop.f32.mrb[74].mxu0  ;;  %v1617_v50 = vpop.f32.mrb[74].mxu1 }
 0x202   : > { %3658 = vst [vmem:[%s4545_s22 + $0x88] sm:$0xff] %v3410_v43   ;;  %v1903_v51 = vadd.f32 %v4524_v1, %v1768_v45  ;;  %v1967_v52 = vadd.f32 %v4524_v1, %v1832_v46  ;;  %v1769_v53 = vmul.f32 %v4519_v63, %v1361_v49  ;;  %v1833_v54 = vmul.f32 %v4519_v63, %v1617_v50  ;;  %v1363_v55 = vpop.f32.mrb[75].mxu0  ;;  %v1619_v56 = vpop.f32.mrb[75].mxu1 }
 0x203   : > { %3690 = vst [vmem:[%s4545_s22 + $0x188] sm:$0xff] %v3570_v44  }
 0x204   : > { %v1904_v57 = vadd.f32 %v4524_v1, %v1769_v53  ;;  %v1968_v58 = vadd.f32 %v4524_v1, %v1833_v54  ;;  %v2031_v59 = vmax.f32 %v1903_v51, 0.0  ;;  %v2095_v60 = vmax.f32 %v1967_v52, 0.0 }
 0x206   : > { %v2032_v61 = vmax.f32 %v1904_v57, 0.0  ;;  %v2096_v62 = vmax.f32 %v1968_v58, 0.0 }
 0x207   : > { %v1366_v0 = vpop.f32.mrb[76].mxu0  ;;  %v1622_v2 = vpop.f32.mrb[76].mxu1 }
 0x208   : > { %v3415_v3 = vpack.c.bf16 %v2032_v61, %v2031_v59  ;;  %v3575_v4 = vpack.c.bf16 %v2096_v62, %v2095_v60  ;;  %v1770_v5 = vmul.f32 %v4519_v63, %v1366_v0  ;;  %v1834_v6 = vmul.f32 %v4519_v63, %v1622_v2  ;;  %v1368_v7 = vpop.f32.mrb[77].mxu0  ;;  %v1624_v8 = vpop.f32.mrb[77].mxu1 }
 0x209   : > { %v1369_v9 = vpop.f32.mrb[78].mxu0  ;;  %v1625_v10 = vpop.f32.mrb[78].mxu1 }
 0x20a   : > { %3659 = vst [vmem:[%s4545_s22 + $0x90] sm:$0xff] %v3415_v3   ;;  %3691 = vst [vmem:[%s4545_s22 + $0x190] sm:$0xff] %v3575_v4   ;;  %v1905_v11 = vadd.f32 %v4524_v1, %v1770_v5  ;;  %v1969_v12 = vadd.f32 %v4524_v1, %v1834_v6  ;;  %v1771_v13 = vmul.f32 %v4519_v63, %v1369_v9  ;;  %v1371_v15 = vpop.f32.mrb[79].mxu0  ;;  %v1627_v16 = vpop.f32.mrb[79].mxu1 }
 0x20b   : > { %v1835_v14 = vmul.f32 %v4519_v63, %v1625_v10  ;;  %v4748_v63 = vld [vmem:[%s4935_s2] ss:$0 sm:$0xff] }
 0x20c   : > { %v1906_v17 = vadd.f32 %v4524_v1, %v1771_v13  ;;  %v2033_v19 = vmax.f32 %v1905_v11, 0.0  ;;  %v2097_v20 = vmax.f32 %v1969_v12, 0.0 }
 0x20d   : > { %v1970_v18 = vadd.f32 %v4524_v1, %v1835_v14 }
 0x20e   : > { %v2034_v21 = vmax.f32 %v1906_v17, 0.0 }
 0x20f   : > { %v2098_v22 = vmax.f32 %v1970_v18, 0.0  ;;  %v1374_v23 = vpop.f32.mrb[80].mxu0  ;;  %v1630_v24 = vpop.f32.mrb[80].mxu1 }
 0x210   : > { %v3420_v25 = vpack.c.bf16 %v2034_v21, %v2033_v19  ;;  %v1772_v27 = vmul.f32 %v4748_v63, %v1374_v23  ;;  %v1836_v28 = vmul.f32 %v4748_v63, %v1630_v24  ;;  %v1376_v1 = vpop.f32.mrb[81].mxu0  ;;  %v1632_v29 = vpop.f32.mrb[81].mxu1 }
 0x211   : > { %v3580_v26 = vpack.c.bf16 %v2098_v22, %v2097_v20  ;;  %v1377_v30 = vpop.f32.mrb[82].mxu0  ;;  %v1633_v31 = vpop.f32.mrb[82].mxu1 }
 0x212   : > { %3660 = vst [vmem:[%s4545_s22 + $0x98] sm:$0xff] %v3420_v25   ;;  %v1907_v33 = vadd.f32 %v4757_v32, %v1772_v27  ;;  %v1971_v34 = vadd.f32 %v4757_v32, %v1836_v28  ;;  %v1773_v35 = vmul.f32 %v4748_v63, %v1377_v30  ;;  %v1837_v36 = vmul.f32 %v4748_v63, %v1633_v31  ;;  %v1379_v37 = vpop.f32.mrb[83].mxu0  ;;  %v1635_v38 = vpop.f32.mrb[83].mxu1 }
 0x213   : > { %3692 = vst [vmem:[%s4545_s22 + $0x198] sm:$0xff] %v3580_v26  }
 0x214   : > { %v1908_v39 = vadd.f32 %v4757_v32, %v1773_v35  ;;  %v1972_v40 = vadd.f32 %v4757_v32, %v1837_v36  ;;  %v2035_v41 = vmax.f32 %v1907_v33, 0.0  ;;  %v2099_v42 = vmax.f32 %v1971_v34, 0.0 }
 0x216   : > { %v2036_v43 = vmax.f32 %v1908_v39, 0.0  ;;  %v2100_v44 = vmax.f32 %v1972_v40, 0.0 }
 0x217   : > { %v1382_v45 = vpop.f32.mrb[84].mxu0  ;;  %v1638_v46 = vpop.f32.mrb[84].mxu1 }
 0x218   : > { %v3425_v47 = vpack.c.bf16 %v2036_v43, %v2035_v41  ;;  %v3585_v48 = vpack.c.bf16 %v2100_v44, %v2099_v42  ;;  %v1774_v49 = vmul.f32 %v4748_v63, %v1382_v45  ;;  %v1838_v50 = vmul.f32 %v4748_v63, %v1638_v46  ;;  %v1384_v51 = vpop.f32.mrb[85].mxu0  ;;  %v1640_v52 = vpop.f32.mrb[85].mxu1 }
 0x219   : > { %v1385_v53 = vpop.f32.mrb[86].mxu0  ;;  %v1641_v54 = vpop.f32.mrb[86].mxu1 }
 0x21a   : > { %3661 = vst [vmem:[%s4545_s22 + $0xa0] sm:$0xff] %v3425_v47   ;;  %3693 = vst [vmem:[%s4545_s22 + $0x1a0] sm:$0xff] %v3585_v48   ;;  %v1909_v55 = vadd.f32 %v4757_v32, %v1774_v49  ;;  %v1973_v56 = vadd.f32 %v4757_v32, %v1838_v50  ;;  %v1775_v57 = vmul.f32 %v4748_v63, %v1385_v53  ;;  %v1387_v59 = vpop.f32.mrb[87].mxu0  ;;  %v1643_v60 = vpop.f32.mrb[87].mxu1 }
 0x21b   : > { %v1839_v58 = vmul.f32 %v4748_v63, %v1641_v54 }
 0x21c   : > { %v1910_v61 = vadd.f32 %v4757_v32, %v1775_v57  ;;  %v2037_v0 = vmax.f32 %v1909_v55, 0.0  ;;  %v2101_v2 = vmax.f32 %v1973_v56, 0.0 }
 0x21d   : > { %v1974_v62 = vadd.f32 %v4757_v32, %v1839_v58 }
 0x21e   : > { %v2038_v3 = vmax.f32 %v1910_v61, 0.0 }
 0x21f   : > { %v2102_v4 = vmax.f32 %v1974_v62, 0.0  ;;  %v1390_v5 = vpop.f32.mrb[88].mxu0  ;;  %v1646_v6 = vpop.f32.mrb[88].mxu1 }
 0x220   : > { %v3430_v7 = vpack.c.bf16 %v2038_v3, %v2037_v0  ;;  %v1776_v9 = vmul.f32 %v4748_v63, %v1390_v5  ;;  %v1840_v10 = vmul.f32 %v4748_v63, %v1646_v6  ;;  %v1392_v11 = vpop.f32.mrb[89].mxu0  ;;  %v1648_v12 = vpop.f32.mrb[89].mxu1 }
 0x221   : > { %v3590_v8 = vpack.c.bf16 %v2102_v4, %v2101_v2  ;;  %v1393_v13 = vpop.f32.mrb[90].mxu0  ;;  %v1649_v14 = vpop.f32.mrb[90].mxu1 }
 0x222   : > { %3662 = vst [vmem:[%s4545_s22 + $0xa8] sm:$0xff] %v3430_v7   ;;  %v1911_v15 = vadd.f32 %v4757_v32, %v1776_v9  ;;  %v1975_v16 = vadd.f32 %v4757_v32, %v1840_v10  ;;  %v1777_v17 = vmul.f32 %v4748_v63, %v1393_v13  ;;  %v1841_v18 = vmul.f32 %v4748_v63, %v1649_v14  ;;  %v1395_v19 = vpop.f32.mrb[91].mxu0  ;;  %v1651_v20 = vpop.f32.mrb[91].mxu1 }
 0x223   : > { %3694 = vst [vmem:[%s4545_s22 + $0x1a8] sm:$0xff] %v3590_v8  }
 0x224   : > { %v1912_v21 = vadd.f32 %v4757_v32, %v1777_v17  ;;  %v1976_v22 = vadd.f32 %v4757_v32, %v1841_v18  ;;  %v2039_v23 = vmax.f32 %v1911_v15, 0.0  ;;  %v2103_v24 = vmax.f32 %v1975_v16, 0.0 }
 0x226   : > { %v2040_v25 = vmax.f32 %v1912_v21, 0.0  ;;  %v2104_v26 = vmax.f32 %v1976_v22, 0.0 }
 0x227   : > { %v1398_v27 = vpop.f32.mrb[92].mxu0  ;;  %v1654_v28 = vpop.f32.mrb[92].mxu1 }
 0x228   : > { %v3435_v1 = vpack.c.bf16 %v2040_v25, %v2039_v23  ;;  %v3595_v29 = vpack.c.bf16 %v2104_v26, %v2103_v24  ;;  %v1778_v30 = vmul.f32 %v4748_v63, %v1398_v27  ;;  %v1842_v31 = vmul.f32 %v4748_v63, %v1654_v28  ;;  %v1400_v33 = vpop.f32.mrb[93].mxu0  ;;  %v1656_v34 = vpop.f32.mrb[93].mxu1 }
 0x229   : > { %v1401_v35 = vpop.f32.mrb[94].mxu0  ;;  %v1657_v36 = vpop.f32.mrb[94].mxu1 }
 0x22a   : > { %3663 = vst [vmem:[%s4545_s22 + $0xb0] sm:$0xff] %v3435_v1   ;;  %3695 = vst [vmem:[%s4545_s22 + $0x1b0] sm:$0xff] %v3595_v29   ;;  %v1913_v37 = vadd.f32 %v4757_v32, %v1778_v30  ;;  %v1977_v38 = vadd.f32 %v4757_v32, %v1842_v31  ;;  %v1779_v39 = vmul.f32 %v4748_v63, %v1401_v35  ;;  %v1403_v41 = vpop.f32.mrb[95].mxu0  ;;  %v1659_v42 = vpop.f32.mrb[95].mxu1 }
 0x22b   : > { %v1843_v40 = vmul.f32 %v4748_v63, %v1657_v36 }
 0x22c   : > { %v1914_v43 = vadd.f32 %v4757_v32, %v1779_v39  ;;  %v2041_v45 = vmax.f32 %v1913_v37, 0.0  ;;  %v2105_v46 = vmax.f32 %v1977_v38, 0.0 }
 0x22d   : > { %v1978_v44 = vadd.f32 %v4757_v32, %v1843_v40 }
 0x22e   : > { %v2042_v47 = vmax.f32 %v1914_v43, 0.0 }
 0x22f   : > { %v2106_v48 = vmax.f32 %v1978_v44, 0.0  ;;  %v1406_v49 = vpop.f32.mrb[96].mxu0  ;;  %v1662_v50 = vpop.f32.mrb[96].mxu1 }
 0x230   : > { %v3440_v51 = vpack.c.bf16 %v2042_v47, %v2041_v45  ;;  %v1780_v53 = vmul.f32 %v4748_v63, %v1406_v49  ;;  %v1844_v54 = vmul.f32 %v4748_v63, %v1662_v50  ;;  %v1408_v55 = vpop.f32.mrb[97].mxu0  ;;  %v1664_v56 = vpop.f32.mrb[97].mxu1 }
 0x231   : > { %v3600_v52 = vpack.c.bf16 %v2106_v48, %v2105_v46  ;;  %v1409_v57 = vpop.f32.mrb[98].mxu0  ;;  %v1665_v58 = vpop.f32.mrb[98].mxu1 }
 0x232   : > { %3664 = vst [vmem:[%s4545_s22 + $0xb8] sm:$0xff] %v3440_v51   ;;  %v1915_v59 = vadd.f32 %v4757_v32, %v1780_v53  ;;  %v1979_v60 = vadd.f32 %v4757_v32, %v1844_v54  ;;  %v1781_v61 = vmul.f32 %v4748_v63, %v1409_v57  ;;  %v1845_v62 = vmul.f32 %v4748_v63, %v1665_v58  ;;  %v1411_v0 = vpop.f32.mrb[99].mxu0  ;;  %v1667_v2 = vpop.f32.mrb[99].mxu1 }
 0x233   : > { %3696 = vst [vmem:[%s4545_s22 + $0x1b8] sm:$0xff] %v3600_v52  }
 0x234   : > { %v1916_v3 = vadd.f32 %v4757_v32, %v1781_v61  ;;  %v1980_v4 = vadd.f32 %v4757_v32, %v1845_v62  ;;  %v2043_v5 = vmax.f32 %v1915_v59, 0.0  ;;  %v2107_v6 = vmax.f32 %v1979_v60, 0.0 }
 0x236   : > { %v2044_v7 = vmax.f32 %v1916_v3, 0.0  ;;  %v2108_v8 = vmax.f32 %v1980_v4, 0.0 }
 0x237   : > { %v1414_v9 = vpop.f32.mrb[100].mxu0  ;;  %v1670_v10 = vpop.f32.mrb[100].mxu1 }
 0x238   : > { %v3445_v11 = vpack.c.bf16 %v2044_v7, %v2043_v5  ;;  %v3605_v12 = vpack.c.bf16 %v2108_v8, %v2107_v6  ;;  %v1782_v13 = vmul.f32 %v4748_v63, %v1414_v9  ;;  %v1846_v14 = vmul.f32 %v4748_v63, %v1670_v10  ;;  %v1416_v15 = vpop.f32.mrb[101].mxu0  ;;  %v1672_v16 = vpop.f32.mrb[101].mxu1 }
 0x239   : > { %v1417_v17 = vpop.f32.mrb[102].mxu0  ;;  %v1673_v18 = vpop.f32.mrb[102].mxu1 }
 0x23a   : > { %3665 = vst [vmem:[%s4545_s22 + $0xc0] sm:$0xff] %v3445_v11   ;;  %3697 = vst [vmem:[%s4545_s22 + $0x1c0] sm:$0xff] %v3605_v12   ;;  %v1917_v19 = vadd.f32 %v4757_v32, %v1782_v13  ;;  %v1981_v20 = vadd.f32 %v4757_v32, %v1846_v14  ;;  %v1783_v21 = vmul.f32 %v4748_v63, %v1417_v17  ;;  %v1419_v23 = vpop.f32.mrb[103].mxu0  ;;  %v1675_v24 = vpop.f32.mrb[103].mxu1 }
 0x23b   : > { %v1847_v22 = vmul.f32 %v4748_v63, %v1673_v18 }
 0x23c   : > { %v1918_v25 = vadd.f32 %v4757_v32, %v1783_v21  ;;  %v2045_v27 = vmax.f32 %v1917_v19, 0.0  ;;  %v2109_v28 = vmax.f32 %v1981_v20, 0.0 }
 0x23d   : > { %v1982_v26 = vadd.f32 %v4757_v32, %v1847_v22 }
 0x23e   : > { %v2046_v1 = vmax.f32 %v1918_v25, 0.0 }
 0x23f   : > { %v2110_v29 = vmax.f32 %v1982_v26, 0.0  ;;  %v1422_v30 = vpop.f32.mrb[104].mxu0  ;;  %v1678_v31 = vpop.f32.mrb[104].mxu1 }
 0x240   : > { %v3450_v33 = vpack.c.bf16 %v2046_v1, %v2045_v27  ;;  %v1784_v35 = vmul.f32 %v4748_v63, %v1422_v30  ;;  %v1848_v36 = vmul.f32 %v4748_v63, %v1678_v31  ;;  %v1424_v37 = vpop.f32.mrb[105].mxu0  ;;  %v1680_v38 = vpop.f32.mrb[105].mxu1 }
 0x241   : > { %v3610_v34 = vpack.c.bf16 %v2110_v29, %v2109_v28  ;;  %v1425_v39 = vpop.f32.mrb[106].mxu0  ;;  %v1681_v40 = vpop.f32.mrb[106].mxu1 }
 0x242   : > { %3666 = vst [vmem:[%s4545_s22 + $0xc8] sm:$0xff] %v3450_v33   ;;  %v1919_v41 = vadd.f32 %v4757_v32, %v1784_v35  ;;  %v1983_v42 = vadd.f32 %v4757_v32, %v1848_v36  ;;  %v1785_v43 = vmul.f32 %v4748_v63, %v1425_v39  ;;  %v1849_v44 = vmul.f32 %v4748_v63, %v1681_v40  ;;  %v1427_v45 = vpop.f32.mrb[107].mxu0  ;;  %v1683_v46 = vpop.f32.mrb[107].mxu1 }
 0x243   : > { %3698 = vst [vmem:[%s4545_s22 + $0x1c8] sm:$0xff] %v3610_v34  }
 0x244   : > { %v1920_v47 = vadd.f32 %v4757_v32, %v1785_v43  ;;  %v1984_v48 = vadd.f32 %v4757_v32, %v1849_v44  ;;  %v2047_v49 = vmax.f32 %v1919_v41, 0.0  ;;  %v2111_v50 = vmax.f32 %v1983_v42, 0.0 }
 0x246   : > { %v2048_v51 = vmax.f32 %v1920_v47, 0.0  ;;  %v2112_v52 = vmax.f32 %v1984_v48, 0.0 }
 0x247   : > { %v1430_v53 = vpop.f32.mrb[108].mxu0  ;;  %v1686_v54 = vpop.f32.mrb[108].mxu1 }
 0x248   : > { %v3455_v55 = vpack.c.bf16 %v2048_v51, %v2047_v49  ;;  %v3615_v56 = vpack.c.bf16 %v2112_v52, %v2111_v50  ;;  %v1786_v57 = vmul.f32 %v4748_v63, %v1430_v53  ;;  %v1850_v58 = vmul.f32 %v4748_v63, %v1686_v54  ;;  %v1432_v59 = vpop.f32.mrb[109].mxu0  ;;  %v1688_v60 = vpop.f32.mrb[109].mxu1 }
 0x249   : > { %v1433_v61 = vpop.f32.mrb[110].mxu0  ;;  %v1689_v62 = vpop.f32.mrb[110].mxu1 }
 0x24a   : > { %3667 = vst [vmem:[%s4545_s22 + $0xd0] sm:$0xff] %v3455_v55   ;;  %3699 = vst [vmem:[%s4545_s22 + $0x1d0] sm:$0xff] %v3615_v56   ;;  %v1921_v0 = vadd.f32 %v4757_v32, %v1786_v57  ;;  %v1985_v2 = vadd.f32 %v4757_v32, %v1850_v58  ;;  %v1787_v3 = vmul.f32 %v4748_v63, %v1433_v61  ;;  %v1435_v5 = vpop.f32.mrb[111].mxu0  ;;  %v1691_v6 = vpop.f32.mrb[111].mxu1 }
 0x24b   : > { %v1851_v4 = vmul.f32 %v4748_v63, %v1689_v62 }
 0x24c   : > { %v1922_v7 = vadd.f32 %v4757_v32, %v1787_v3  ;;  %v2049_v9 = vmax.f32 %v1921_v0, 0.0  ;;  %v2113_v10 = vmax.f32 %v1985_v2, 0.0 }
 0x24d   : > { %v1986_v8 = vadd.f32 %v4757_v32, %v1851_v4 }
 0x24e   : > { %v2050_v11 = vmax.f32 %v1922_v7, 0.0 }
 0x24f   : > { %v2114_v12 = vmax.f32 %v1986_v8, 0.0  ;;  %v1438_v13 = vpop.f32.mrb[112].mxu0  ;;  %v1694_v14 = vpop.f32.mrb[112].mxu1 }
 0x250   : > { %v3460_v15 = vpack.c.bf16 %v2050_v11, %v2049_v9  ;;  %v1788_v17 = vmul.f32 %v4748_v63, %v1438_v13  ;;  %v1852_v18 = vmul.f32 %v4748_v63, %v1694_v14  ;;  %v1440_v19 = vpop.f32.mrb[113].mxu0  ;;  %v1696_v20 = vpop.f32.mrb[113].mxu1 }
 0x251   : > { %v3620_v16 = vpack.c.bf16 %v2114_v12, %v2113_v10  ;;  %v1441_v21 = vpop.f32.mrb[114].mxu0  ;;  %v1697_v22 = vpop.f32.mrb[114].mxu1 }
 0x252   : > { %3668 = vst [vmem:[%s4545_s22 + $0xd8] sm:$0xff] %v3460_v15   ;;  %v1923_v23 = vadd.f32 %v4757_v32, %v1788_v17  ;;  %v1987_v24 = vadd.f32 %v4757_v32, %v1852_v18  ;;  %v1789_v25 = vmul.f32 %v4748_v63, %v1441_v21  ;;  %v1853_v26 = vmul.f32 %v4748_v63, %v1697_v22  ;;  %v1443_v27 = vpop.f32.mrb[115].mxu0  ;;  %v1699_v28 = vpop.f32.mrb[115].mxu1 }
 0x253   : > { %3700 = vst [vmem:[%s4545_s22 + $0x1d8] sm:$0xff] %v3620_v16  }
 0x254   : > { %v1924_v1 = vadd.f32 %v4757_v32, %v1789_v25  ;;  %v1988_v29 = vadd.f32 %v4757_v32, %v1853_v26  ;;  %v2051_v30 = vmax.f32 %v1923_v23, 0.0  ;;  %v2115_v31 = vmax.f32 %v1987_v24, 0.0 }
 0x256   : > { %v2052_v33 = vmax.f32 %v1924_v1, 0.0  ;;  %v2116_v34 = vmax.f32 %v1988_v29, 0.0 }
 0x257   : > { %v1446_v35 = vpop.f32.mrb[116].mxu0  ;;  %v1702_v36 = vpop.f32.mrb[116].mxu1 }
 0x258   : > { %v3465_v37 = vpack.c.bf16 %v2052_v33, %v2051_v30  ;;  %v3625_v38 = vpack.c.bf16 %v2116_v34, %v2115_v31  ;;  %v1790_v39 = vmul.f32 %v4748_v63, %v1446_v35  ;;  %v1854_v40 = vmul.f32 %v4748_v63, %v1702_v36  ;;  %v1448_v41 = vpop.f32.mrb[117].mxu0  ;;  %v1704_v42 = vpop.f32.mrb[117].mxu1 }
 0x259   : > { %v1449_v43 = vpop.f32.mrb[118].mxu0  ;;  %v1705_v44 = vpop.f32.mrb[118].mxu1 }
 0x25a   : > { %3669 = vst [vmem:[%s4545_s22 + $0xe0] sm:$0xff] %v3465_v37   ;;  %3701 = vst [vmem:[%s4545_s22 + $0x1e0] sm:$0xff] %v3625_v38   ;;  %v1925_v45 = vadd.f32 %v4757_v32, %v1790_v39  ;;  %v1989_v46 = vadd.f32 %v4757_v32, %v1854_v40  ;;  %v1791_v47 = vmul.f32 %v4748_v63, %v1449_v43  ;;  %v1451_v49 = vpop.f32.mrb[119].mxu0  ;;  %v1707_v50 = vpop.f32.mrb[119].mxu1 }
 0x25b   : > { %v1855_v48 = vmul.f32 %v4748_v63, %v1705_v44 }
 0x25c   : > { %v1926_v51 = vadd.f32 %v4757_v32, %v1791_v47  ;;  %v2053_v53 = vmax.f32 %v1925_v45, 0.0  ;;  %v2117_v54 = vmax.f32 %v1989_v46, 0.0 }
 0x25d   : > { %v1990_v52 = vadd.f32 %v4757_v32, %v1855_v48 }
 0x25e   : > { %v2054_v55 = vmax.f32 %v1926_v51, 0.0 }
 0x25f   : > { %v2118_v56 = vmax.f32 %v1990_v52, 0.0  ;;  %v1454_v57 = vpop.f32.mrb[120].mxu0  ;;  %v1710_v58 = vpop.f32.mrb[120].mxu1 }
 0x260   : > { %v3470_v59 = vpack.c.bf16 %v2054_v55, %v2053_v53  ;;  %v1792_v61 = vmul.f32 %v4748_v63, %v1454_v57  ;;  %v1856_v62 = vmul.f32 %v4748_v63, %v1710_v58  ;;  %v1456_v0 = vpop.f32.mrb[121].mxu0  ;;  %v1712_v2 = vpop.f32.mrb[121].mxu1 }
 0x261   : > { %v3630_v60 = vpack.c.bf16 %v2118_v56, %v2117_v54  ;;  %v1457_v3 = vpop.f32.mrb[122].mxu0  ;;  %v1713_v4 = vpop.f32.mrb[122].mxu1 }
 0x262   : > { %3670 = vst [vmem:[%s4545_s22 + $0xe8] sm:$0xff] %v3470_v59   ;;  %v1927_v5 = vadd.f32 %v4757_v32, %v1792_v61  ;;  %v1991_v6 = vadd.f32 %v4757_v32, %v1856_v62  ;;  %v1793_v7 = vmul.f32 %v4748_v63, %v1457_v3  ;;  %v1857_v8 = vmul.f32 %v4748_v63, %v1713_v4  ;;  %v1459_v9 = vpop.f32.mrb[123].mxu0  ;;  %v1715_v10 = vpop.f32.mrb[123].mxu1 }
 0x263   : > { %3702 = vst [vmem:[%s4545_s22 + $0x1e8] sm:$0xff] %v3630_v60  }
 0x264   : > { %v1928_v11 = vadd.f32 %v4757_v32, %v1793_v7  ;;  %v1992_v12 = vadd.f32 %v4757_v32, %v1857_v8  ;;  %v2055_v13 = vmax.f32 %v1927_v5, 0.0  ;;  %v2119_v14 = vmax.f32 %v1991_v6, 0.0 }
 0x266   : > { %v2056_v15 = vmax.f32 %v1928_v11, 0.0  ;;  %v2120_v16 = vmax.f32 %v1992_v12, 0.0 }
 0x267   : > { %v1462_v17 = vpop.f32.mrb[124].mxu0  ;;  %v1718_v18 = vpop.f32.mrb[124].mxu1 }
 0x268   : > { %v3475_v19 = vpack.c.bf16 %v2056_v15, %v2055_v13  ;;  %v3635_v20 = vpack.c.bf16 %v2120_v16, %v2119_v14  ;;  %v1794_v21 = vmul.f32 %v4748_v63, %v1462_v17  ;;  %v1858_v22 = vmul.f32 %v4748_v63, %v1718_v18  ;;  %v1464_v23 = vpop.f32.mrb[125].mxu0  ;;  %v1720_v24 = vpop.f32.mrb[125].mxu1 }
 0x269   : > { %v1465_v25 = vpop.f32.mrb[126].mxu0  ;;  %v1721_v26 = vpop.f32.mrb[126].mxu1 }
 0x26a   : > { %3671 = vst [vmem:[%s4545_s22 + $0xf0] sm:$0xff] %v3475_v19   ;;  %3703 = vst [vmem:[%s4545_s22 + $0x1f0] sm:$0xff] %v3635_v20   ;;  %v1929_v27 = vadd.f32 %v4757_v32, %v1794_v21  ;;  %v1993_v28 = vadd.f32 %v4757_v32, %v1858_v22  ;;  %v1795_v1 = vmul.f32 %v4748_v63, %v1465_v25  ;;  %v1467_v30 = vpop.f32.mrb[127].mxu0  ;;  %v1723_v31 = vpop.f32.mrb[127].mxu1 }
 0x26b   : > { %v1859_v29 = vmul.f32 %v4748_v63, %v1721_v26 }
 0x26c   : > { %v1930_v33 = vadd.f32 %v4757_v32, %v1795_v1  ;;  %v2057_v35 = vmax.f32 %v1929_v27, 0.0  ;;  %v2121_v36 = vmax.f32 %v1993_v28, 0.0 }
 0x26d   : > { %v1994_v34 = vadd.f32 %v4757_v32, %v1859_v29 }
 0x26e   : > { %v2058_v37 = vmax.f32 %v1930_v33, 0.0 }
 0x26f   : > { %v2122_v38 = vmax.f32 %v1994_v34, 0.0 }
 0x270   : > { %v3480_v63 = vpack.c.bf16 %v2058_v37, %v2057_v35 }
 0x271   : > { %v3640_v39 = vpack.c.bf16 %v2122_v38, %v2121_v36 }
 0x272   : > { %3672 = vst [vmem:[%s4545_s22 + $0xf8] sm:$0xff] %v3480_v63  }
 0x273   : > { %3704 = vst [vmem:[%s4545_s22 + $0x1f8] sm:$0xff] %v3640_v39  }
 0x274   : > { %4098 = shalt.err (!%p4095_p5)
}
 0x275   : > { %s4099_s21 = scalar_lea.hbm %s4880_s29, 8192  ;;  %s4103_s13 = scalar_lea.hbm %s4937_s4, 16384 }
 0x276   : > { %p4100_p9 = scmp.ne.s32.totalorder %s4880_s29, %s4099_s21  ;;  %p4104_p3 = scmp.lt.u32.totalorder %s4880_s29, %s4937_s4 }
 0x277   : > { %p4105_p7 = scmp.lt.u32.totalorder %s4103_s13, %s4099_s21  ;;  %p4107_p4 = scmp.lt.u32.totalorder %s4099_s21, %s4880_s29 }
 0x278   : > { %p4101_p1 = pnand %p4100_p9, %p4304_p10 }
 0x279   : > { %p4106_p13 = por %p4105_p7, %p4104_p3 }
 0x27a   : > { %p4102_p2 = pneg %p4101_p1 }
 0x27b   : > { %p4108_p6 = por %p4107_p4, %p4106_p13 }
 0x27d   : > { %p4109_p8 = pnand %p4108_p6, %p4102_p2 }
 0x27f   : > { %4112 = shalt.err (!%p4109_p8)
}
 0x280   : > { %s4181_s6 = smov 64   ;;  %s4182_s11 = smov 4  }
 0x281   : > { %3743 = dma.vmem_to_hbm [thread:$0]  (%p4304_p10), %s4882_s9, 8192, %s4880_s29, %s2764_s18, %s4181_s6, %s4181_s6, %s4182_s11  }
 0x282 PF: > { %s2793_s12 = sand.u32 1, %s4151_s15   ;;  %p4955_p12 = scmp.ne.s32.totalorder %s4945_s26, 0 }
 0x283   : > { %p4956_p11 = scmp.ge.s32.totalorder %s4171_s20, 2  ;;  %s2794_s23 = scalar_lea.sflag [#allocation4], %s2793_s12 }
 0x285   : > { %p3754_p0 = pnand %p4956_p11, %p4955_p12 }
 0x287   : > { %4146 = dma.done.wait (!%p3754_p0), %s2794_s23, 8192  }
 0x288   : > { %4148 = vsyncadd (!%p3754_p0), %s2794_s23, 4294959104  ;;  %s21_s20 = sadd.s32 1, %s4171_s20   ;;  %s4957_s15 = smov %s4155_s16 }
 0x289   : > { %p18_p5 = scmp.ge.s32.totalorder %s21_s20, 4   ;;  %s4958_s16 = smov %s4159_s17 }
 0x28a   : > { %s4959_s17 = smov %s4313_s10  ;;  %s4960_s18 = smov %s4167_s19 }
 0x28b   : > { %s4961_s19 = smov %s4963_s5  ;;  %20 = sbr.rel (!%p18_p5) target bundleno = 7 (0x7), region = 92 }
 0x292   :  { %2799 = vsyncpa [#allocation3], 1 }
 0x293   :  { %2801 = vsyncpa [#allocation3 + $0x1], 1 }
 0x294   :  { %2802 = vsyncpa [#allocation6], 1 }
 0x295   :  { %2803 = vsyncpa [#allocation4], 1 }
 0x296   :  { %2805 = vsyncpa [#allocation4 + $0x1], 1 }

</bundles_post_ra>
